<compile_context>
chip_gen: v7x
topology: tpu7x:2x2x1
jax: 0.10.0
libtpu: 0.0.40
codegen_flags: <defaults>
</compile_context>

<pallas_src>
import functools

import jax
import jax.numpy as jnp
import numpy as np
from jax.experimental import pallas as pl
from jax.experimental.pallas import tpu as pltpu

LN_EPS = 1e-5            # nn.LayerNorm default
NEG_INF = -1000000000.0  # same constant as the PyTorch forward


def _gelu_tanh(x):
    # BERT-style tanh GELU approximation used in the reference modules.py
    return 0.5 * x * (1.0 + jnp.tanh(jnp.sqrt(2.0 / jnp.pi) * (x + 0.044715 * x ** 3)))


def _layer_norm(x, g, b):
    mean = jnp.mean(x, axis=-1, keepdims=True)
    var = jnp.mean((x - mean) ** 2, axis=-1, keepdims=True)
    return (x - mean) * jax.lax.rsqrt(var + LN_EPS) * g + b


def user_encoder_kernel(log_mask_ref, x_ref, pos_ref,
                        ln1g_ref, ln1b_ref, wqkv_ref, bqkv_ref, woh_ref, bo_ref,
                        ln2g_ref, ln2b_ref, w1_ref, b1_ref, w2_ref, b2_ref,
                        o_ref, mask_ref, *, n_heads, tile_b):
    l = pl.program_id(1)                 # layer index (grid axis, "arbitrary")
    M, D = o_ref.shape                   # M = Bt * L rows of this batch tile
    Bt = tile_b
    L = M // Bt
    H = n_heads
    dk = D // H

    # ---- once per batch tile (l == 0): init resident activation + additive mask ----
    @pl.when(l == 0)
    def _():
        # x0 = input_embs + position_embedding   (dropout = identity in eval mode)
        x0 = x_ref[...].reshape(Bt, L, D) + pos_ref[...]
        o_ref[...] = x0.reshape(M, D)
        # Additive mask: causal tril AND key-padding(log_mask). Built once in VMEM,
        # reused by every layer; the dense (B, L, L) mask never touches HBM.
        lm = log_mask_ref[...]                                    # (Bt, L) int32
        row = jax.lax.broadcasted_iota(jnp.int32, (L, L), 0)
        col = jax.lax.broadcasted_iota(jnp.int32, (L, L), 1)
        keep = (col <= row)[None, :, :] & (lm != 0)[:, None, :]   # (Bt, L, L)
        mask_ref[...] = jnp.where(keep, 0.0, NEG_INF).astype(jnp.float32)

    x = o_ref[...]                        # (M, D) f32, resident across the layer axis
    add_mask = mask_ref[...]              # (Bt, L, L) f32

    # ---------------- attention sublayer: x + Attn(LN(x)) ----------------
    h_ln = _layer_norm(x, ln1g_ref[0], ln1b_ref[0]).astype(jnp.bfloat16)

    # Head-major QKV: 3H lane-aligned (M, D) @ (D, dk) MXU passes; each head lands on a
    # leading axis directly (no unaligned lane slicing / XLU relayouts).
    def proj(g):
        y = jnp.dot(h_ln, wqkv_ref[0, g], preferred_element_type=jnp.float32)
        return (y + bqkv_ref[0, g]).reshape(Bt, L, dk).astype(jnp.bfloat16)

    qg = jnp.concatenate([proj(h) for h in range(H)], axis=0)          # (H*Bt, L, dk)
    kg = jnp.concatenate([proj(H + h) for h in range(H)], axis=0)      # 1/sqrt(dk) folded
    vg = jnp.concatenate([proj(2 * H + h) for h in range(H)], axis=0)  #   into Wq / bq

    scores = jnp.einsum('gqd,gkd->gqk', qg, kg,
                        preferred_element_type=jnp.float32)            # (H*Bt, L, L)
    scores = scores.reshape(H, Bt, L, L) + add_mask[None]              # bcast mask over H
    scores = scores - jnp.max(scores, axis=-1, keepdims=True)
    p = jnp.exp(scores)
    p = p * pl.reciprocal(jnp.sum(p, axis=-1, keepdims=True), approx=True)
    p = p.reshape(H * Bt, L, L).astype(jnp.bfloat16)

    ctx = jnp.einsum('gqk,gkd->gqd', p, vg,
                     preferred_element_type=jnp.float32)               # (H*Bt, L, dk)

    # Per-head output projection accumulated in f32 — no (H, M, D) intermediate.
    attn = None
    for h in range(H):
        ctx_h = ctx[h * Bt:(h + 1) * Bt].reshape(M, dk).astype(jnp.bfloat16)
        part = jnp.dot(ctx_h, woh_ref[0, h], preferred_element_type=jnp.float32)
        attn = part if attn is None else attn + part
    x = x + attn + bo_ref[0]                                           # dropout = identity

    # ---------------- feed-forward sublayer: x + FFN(LN(x)) ----------------
    h2 = _layer_norm(x, ln2g_ref[0], ln2b_ref[0]).astype(jnp.bfloat16)
    f = jnp.dot(h2, w1_ref[0], preferred_element_type=jnp.float32) + b1_ref[0]
    f = _gelu_tanh(f)                                                  # f32 (EUP)
    f = jnp.dot(f.astype(jnp.bfloat16), w2_ref[0],
                preferred_element_type=jnp.float32) + b2_ref[0]
    x = x + f                                                          # dropout = identity

    # Stays resident in VMEM; flushed to HBM only when the batch-tile block changes.
    o_ref[...] = x


def prepare_weights(params, n_heads):
    """Run ONCE (outside the forward): stack per-layer params on a leading layer axis,
    re-layout QKV head-major with 1/sqrt(dk) folded into Q, split Wo per head, and cast
    matmul weights to bf16 (LN params / biases stay f32)."""
    layers = params['layers']
    D = layers[0]['wq'].shape[0]
    H = n_heads
    dk = D // H
    scale = 1.0 / (dk ** 0.5)

    def head_major_w(w, s=1.0):       # (D, D) -> (H, D, dk)
        return (w * s).reshape(D, H, dk).transpose(1, 0, 2)

    def head_major_b(b, s=1.0):       # (1, D) -> (H, 1, dk)
        return (b * s).reshape(1, H, dk).transpose(1, 0, 2)

    wqkv = jnp.stack([jnp.concatenate([head_major_w(lp['wq'], scale),
                                       head_major_w(lp['wk']),
                                       head_major_w(lp['wv'])], axis=0)
                      for lp in layers], axis=0).astype(jnp.bfloat16)   # (nl, 3H, D, dk)
    bqkv = jnp.stack([jnp.concatenate([head_major_b(lp['bq'], scale),
                                       head_major_b(lp['bk']),
                                       head_major_b(lp['bv'])], axis=0)
                      for lp in layers], axis=0)                        # (nl, 3H, 1, dk)
    # rows h*dk:(h+1)*dk of Wo multiply the ctx columns of head h
    woh = jnp.stack([lp['wo'].reshape(H, dk, D) for lp in layers],
                    axis=0).astype(jnp.bfloat16)                        # (nl, H, dk, D)

    def stk(name):
        return jnp.stack([lp[name] for lp in layers], axis=0)

    return {
        'ln1_g': stk('ln1_g'), 'ln1_b': stk('ln1_b'),
        'wqkv': wqkv, 'bqkv': bqkv, 'woh': woh, 'bo': stk('bo'),
        'ln2_g': stk('ln2_g'), 'ln2_b': stk('ln2_b'),
        'w1': stk('w1').astype(jnp.bfloat16), 'b1': stk('b1'),
        'w2': stk('w2').astype(jnp.bfloat16), 'b2': stk('b2'),
    }


def _pick_batch_tile(B, L):
    # Target >= ~256 MXU rows per grid step, never exceed B, keep B % Bt == 0,
    # and keep the (Bt*L, D) block sublane-aligned.
    target = max(1, -(-256 // L))      # ceil(256 / L)
    bt = min(B, target)
    while B % bt:
        bt -= 1
    if (bt * L) % 8 != 0:
        bt = B
    return bt


def user_encoder_forward(input_embs, log_mask, prepared, pos_emb, n_heads, n_layers,
                         tile_b=None):
    B, L, D = input_embs.shape
    Bt = _pick_batch_tile(B, L) if tile_b is None else tile_b
    assert B % Bt == 0

    pos = pos_emb[:L].astype(jnp.float32)                        # (L, D)
    x2d = input_embs.astype(jnp.float32).reshape(B * L, D)       # flattened (B*L, D) slab

    weight_order = ('ln1_g', 'ln1_b', 'wqkv', 'bqkv', 'woh', 'bo',
                    'ln2_g', 'ln2_b', 'w1', 'b1', 'w2', 'b2')
    weights = [prepared[n] for n in weight_order]

    in_specs = [
        pl.BlockSpec((Bt, L), lambda b, l: (b, 0)),              # log_mask, per batch tile
        pl.BlockSpec((Bt * L, D), lambda b, l: (b, 0)),          # input slab, per batch tile
        pl.BlockSpec((L, D), lambda b, l: (0, 0)),               # position embedding
    ]
    for t in weights:                                            # per-layer weight streaming
        nd = t.ndim
        in_specs.append(
            pl.BlockSpec((1,) + t.shape[1:],
                         lambda b, l, _nd=nd: (l,) + (0,) * (_nd - 1)))

    kernel = functools.partial(user_encoder_kernel, n_heads=n_heads, tile_b=Bt)
    out2d = pl.pallas_call(
        kernel,
        out_shape=jax.ShapeDtypeStruct((B * L, D), jnp.float32),
        grid=(B // Bt, n_layers),
        in_specs=in_specs,
        # index_map constant along l -> activation stays resident across layers,
        # exactly one HBM store per batch tile.
        out_specs=pl.BlockSpec((Bt * L, D), lambda b, l: (b, 0)),
        scratch_shapes=[pltpu.VMEM((Bt, L, L), jnp.float32)],    # additive attention mask
        compiler_params=pltpu.CompilerParams(
            dimension_semantics=("parallel", "arbitrary"),
            vmem_limit_bytes=32 * 1024 * 1024),                  # tune for production D/L
    )(log_mask.astype(jnp.int32), x2d, pos, *weights)
    return out2d.reshape(B, L, D)


# ------------------------- deterministic parameter init -------------------------
def xavier_normal(key, fan_in, fan_out):
    std = (2.0 / (fan_in + fan_out)) ** 0.5
    return std * jax.random.normal(key, (fan_in, fan_out), dtype=jnp.float32)


def init_params(key, max_seq_len, d_model, n_layers):
    d_ffn = 4 * d_model
    key, kp = jax.random.split(key)
    pos_emb = xavier_normal(kp, max_seq_len, d_model).reshape(max_seq_len, d_model)
    layers = []
    for _ in range(n_layers):
        key, *ks = jax.random.split(key, 7)
        layers.append({
            'ln1_g': jnp.ones((1, d_model), jnp.float32),
            'ln1_b': jnp.zeros((1, d_model), jnp.float32),
            'wq': xavier_normal(ks[0], d_model, d_model),
            'bq': jnp.zeros((1, d_model), jnp.float32),
            'wk': xavier_normal(ks[1], d_model, d_model),
            'bk': jnp.zeros((1, d_model), jnp.float32),
            'wv': xavier_normal(ks[2], d_model, d_model),
            'bv': jnp.zeros((1, d_model), jnp.float32),
            'wo': xavier_normal(ks[3], d_model, d_model),
            'bo': jnp.zeros((1, d_model), jnp.float32),
            'ln2_g': jnp.ones((1, d_model), jnp.float32),
            'ln2_b': jnp.zeros((1, d_model), jnp.float32),
            'w1': xavier_normal(ks[4], d_model, d_ffn),
            'b1': jnp.zeros((1, d_ffn), jnp.float32),
            'w2': xavier_normal(ks[5], d_ffn, d_model),
            'b2': jnp.zeros((1, d_model), jnp.float32),
        })
    return {'pos_emb': pos_emb, 'layers': layers}


# ------------------------- pure-JAX f32 reference (for validation) -------------------------
def build_att_mask(log_mask):
    L = log_mask.shape[-1]
    key_mask = (log_mask != 0)[:, None, :]
    causal = jnp.tril(jnp.ones((L, L), dtype=bool))[None]
    return jnp.where(key_mask & causal, 0.0, NEG_INF).astype(jnp.float32)


def reference_forward(input_embs, log_mask, params, n_heads):
    B, L, D = input_embs.shape
    dk = D // n_heads
    att_mask = build_att_mask(log_mask)
    x = input_embs + params['pos_emb'][:L][None]
    for lp in params['layers']:
        h = _layer_norm(x, lp['ln1_g'], lp['ln1_b'])
        q = (h @ lp['wq'] + lp['bq']).reshape(B, L, n_heads, dk).transpose(0, 2, 1, 3)
        k = (h @ lp['wk'] + lp['bk']).reshape(B, L, n_heads, dk).transpose(0, 2, 1, 3)
        v = (h @ lp['wv'] + lp['bv']).reshape(B, L, n_heads, dk).transpose(0, 2, 1, 3)
        scores = jnp.einsum('bhqd,bhkd->bhqk', q, k) / jnp.sqrt(jnp.float32(dk))
        scores = scores + att_mask[:, None]
        p = jax.nn.softmax(scores, axis=-1)
        ctx = jnp.einsum('bhqk,bhkd->bhqd', p, v).transpose(0, 2, 1, 3).reshape(B, L, D)
        x = x + (ctx @ lp['wo'] + lp['bo'])
        h2 = _layer_norm(x, lp['ln2_g'], lp['ln2_b'])
        f = _gelu_tanh(h2 @ lp['w1'] + lp['b1']) @ lp['w2'] + lp['b2']
        x = x + f
    return x


if __name__ == "__main__":
    # User_Encoder(item_num=1000, max_seq_len=16, item_dim=32, num_attention_heads=2,
    #              dropout=0.1 (eval -> identity), n_layers=2)
    B, L, D, H, N_LAYERS, MAX_SEQ = 4, 8, 32, 2, 2, 16

    root = jax.random.PRNGKey(0)
    k_params, k_x = jax.random.split(root)
    params = init_params(k_params, MAX_SEQ, D, N_LAYERS)
    prepared = prepare_weights(params, H)        # once, outside the forward (no per-call prep)

    input_embs = jax.random.normal(k_x, (B, L, D), dtype=jnp.float32)
    log_mask = jnp.array([[1, 1, 1, 1, 1, 1, 1, 1],
                          [1, 1, 1, 1, 1, 0, 0, 0],
                          [1, 1, 1, 0, 0, 0, 0, 0],
                          [1, 1, 1, 1, 1, 1, 1, 0]], dtype=jnp.int32)

    out = user_encoder_forward(input_embs, log_mask, prepared, params['pos_emb'],
                               H, N_LAYERS)
    out = jax.block_until_ready(out)

    ref = reference_forward(input_embs, log_mask, params, H)
    assert out.shape == (B, L, D)
    assert np.all(np.isfinite(np.asarray(out)))
    # bf16 MXU matmuls (f32 accumulation), pre-scaled bf16 Q weights and the approximate
    # EUP softmax reciprocal -> loosened tolerance vs. the pure-f32 reference.
    np.testing.assert_allclose(np.asarray(out), np.asarray(ref), atol=5e-2, rtol=5e-2)

    print("KERNEL_OK")
</pallas_src>

<mosaic_0001>
module attributes {stable_mosaic.version = 11 : i64} {
  func.func @user_encoder_kernel(%arg0: i32, %arg1: i32, %arg2: memref<4x8xi32, #tpu.memory_space<vmem>>, %arg3: memref<32x32xf32, #tpu.memory_space<vmem>>, %arg4: memref<8x32xf32, #tpu.memory_space<vmem>>, %arg5: memref<1x1x32xf32, #tpu.memory_space<vmem>>, %arg6: memref<1x1x32xf32, #tpu.memory_space<vmem>>, %arg7: memref<1x6x32x16xbf16, #tpu.memory_space<vmem>>, %arg8: memref<1x6x1x16xf32, #tpu.memory_space<vmem>>, %arg9: memref<1x2x16x32xbf16, #tpu.memory_space<vmem>>, %arg10: memref<1x1x32xf32, #tpu.memory_space<vmem>>, %arg11: memref<1x1x32xf32, #tpu.memory_space<vmem>>, %arg12: memref<1x1x32xf32, #tpu.memory_space<vmem>>, %arg13: memref<1x32x128xbf16, #tpu.memory_space<vmem>>, %arg14: memref<1x1x128xf32, #tpu.memory_space<vmem>>, %arg15: memref<1x128x32xbf16, #tpu.memory_space<vmem>>, %arg16: memref<1x1x32xf32, #tpu.memory_space<vmem>>, %arg17: memref<32x32xf32, #tpu.memory_space<vmem>>, %arg18: memref<4x8x8xf32, #tpu.memory_space<vmem>>) attributes {dimension_semantics = [#tpu.dimension_semantics<parallel>, #tpu.dimension_semantics<arbitrary>], iteration_bounds = array<i64: 1, 2>, scalar_prefetch = 0 : i64, scratch_operands = 1 : i64, tpu.core_type = #tpu.core_type<tc>, window_params = [{transform_indices = @transform_0, window_bounds = array<i64: 4, 8>}, {transform_indices = @transform_1, window_bounds = array<i64: 32, 32>}, {pipeline_mode = #tpu.pipeline_mode<synchronous>, transform_indices = @transform_2, window_bounds = array<i64: 8, 32>}, {transform_indices = @transform_3, window_bounds = array<i64: 1, 1, 32>}, {transform_indices = @transform_4, window_bounds = array<i64: 1, 1, 32>}, {transform_indices = @transform_5, window_bounds = array<i64: 1, 6, 32, 16>}, {transform_indices = @transform_6, window_bounds = array<i64: 1, 6, 1, 16>}, {transform_indices = @transform_7, window_bounds = array<i64: 1, 2, 16, 32>}, {transform_indices = @transform_8, window_bounds = array<i64: 1, 1, 32>}, {transform_indices = @transform_9, window_bounds = array<i64: 1, 1, 32>}, {transform_indices = @transform_10, window_bounds = array<i64: 1, 1, 32>}, {transform_indices = @transform_11, window_bounds = array<i64: 1, 32, 128>}, {transform_indices = @transform_12, window_bounds = array<i64: 1, 1, 128>}, {transform_indices = @transform_13, window_bounds = array<i64: 1, 128, 32>}, {transform_indices = @transform_14, window_bounds = array<i64: 1, 1, 32>}, {transform_indices = @transform_15, window_bounds = array<i64: 32, 32>}]} {
    %c0_i32 = arith.constant 0 : i32
    %0 = arith.cmpi eq, %arg1, %c0_i32 : i32
    %1 = arith.extui %0 : i1 to i32
    %c0_i32_0 = arith.constant 0 : i32
    %2 = arith.cmpi ne, %1, %c0_i32_0 : i32
    scf.if %2 {
      %c0_112 = arith.constant 0 : index
      %c0_113 = arith.constant 0 : index
      %183 = vector.load %arg3[%c0_112, %c0_113] : memref<32x32xf32, #tpu.memory_space<vmem>>, vector<32x32xf32>
      %184 = vector.shape_cast %183 : vector<32x32xf32> to vector<4x8x32xf32>
      %c0_114 = arith.constant 0 : index
      %c0_115 = arith.constant 0 : index
      %185 = vector.load %arg4[%c0_114, %c0_115] : memref<8x32xf32, #tpu.memory_space<vmem>>, vector<8x32xf32>
      %186 = vector.shape_cast %185 : vector<8x32xf32> to vector<1x8x32xf32>
      %187 = vector.broadcast %186 : vector<1x8x32xf32> to vector<4x8x32xf32>
      %188 = arith.addf %184, %187 : vector<4x8x32xf32>
      %189 = vector.shape_cast %188 : vector<4x8x32xf32> to vector<32x32xf32>
      %c0_116 = arith.constant 0 : index
      %c0_117 = arith.constant 0 : index
      %190 = vector.load %arg17[%c0_116, %c0_117] : memref<32x32xf32, #tpu.memory_space<vmem>>, vector<32x32xf32>
      tpu.vector_store %arg17[%c0_116, %c0_117], %189 {strides = array<i32>} : memref<32x32xf32, #tpu.memory_space<vmem>>, vector<32x32xf32>,
      %c0_118 = arith.constant 0 : index
      %c0_119 = arith.constant 0 : index
      %191 = vector.load %arg2[%c0_118, %c0_119] : memref<4x8xi32, #tpu.memory_space<vmem>>, vector<4x8xi32>
      %192 = tpu.iota {dimensions = array<i32: 0>} : vector<8x8xi32>
      %193 = tpu.iota {dimensions = array<i32: 1>} : vector<8x8xi32>
      %194 = arith.cmpi sle, %193, %192 : vector<8x8xi32>
      %195 = vector.shape_cast %194 : vector<8x8xi1> to vector<1x8x8xi1>
      %c0_i32_120 = arith.constant 0 : i32
      %196 = vector.broadcast %c0_i32_120 : i32 to vector<4x8xi32>
      %197 = arith.cmpi ne, %191, %196 : vector<4x8xi32>
      %198 = vector.shape_cast %197 : vector<4x8xi1> to vector<4x1x8xi1>
      %199 = vector.broadcast %195 : vector<1x8x8xi1> to vector<4x8x8xi1>
      %200 = vector.broadcast %198 : vector<4x1x8xi1> to vector<4x8x8xi1>
      %201 = arith.andi %199, %200 : vector<4x8x8xi1>
      %cst_121 = arith.constant 0.000000e+00 : f32
      %cst_122 = arith.constant -1.000000e+09 : f32
      %202 = vector.broadcast %cst_121 : f32 to vector<4x8x8xf32>
      %203 = vector.broadcast %cst_122 : f32 to vector<4x8x8xf32>
      %204 = arith.select %201, %202, %203 : vector<4x8x8xi1>, vector<4x8x8xf32>
      %c0_123 = arith.constant 0 : index
      %c0_124 = arith.constant 0 : index
      %c0_125 = arith.constant 0 : index
      %205 = vector.load %arg18[%c0_123, %c0_124, %c0_125] : memref<4x8x8xf32, #tpu.memory_space<vmem>>, vector<4x8x8xf32>
      tpu.vector_store %arg18[%c0_123, %c0_124, %c0_125], %204 {strides = array<i32>} : memref<4x8x8xf32, #tpu.memory_space<vmem>>, vector<4x8x8xf32>,
    } else {
    }
    %c0 = arith.constant 0 : index
    %c0_1 = arith.constant 0 : index
    %3 = vector.load %arg17[%c0, %c0_1] : memref<32x32xf32, #tpu.memory_space<vmem>>, vector<32x32xf32>
    %c0_2 = arith.constant 0 : index
    %c0_3 = arith.constant 0 : index
    %c0_4 = arith.constant 0 : index
    %4 = vector.load %arg18[%c0_2, %c0_3, %c0_4] : memref<4x8x8xf32, #tpu.memory_space<vmem>>, vector<4x8x8xf32>
    %c0_5 = arith.constant 0 : index
    %c0_6 = arith.constant 0 : index
    %c0_7 = arith.constant 0 : index
    %5 = vector.load %arg5[%c0_5, %c0_6, %c0_7] : memref<1x1x32xf32, #tpu.memory_space<vmem>>, vector<1x1x32xf32>
    %6 = vector.shape_cast %5 : vector<1x1x32xf32> to vector<1x32xf32>
    %c0_8 = arith.constant 0 : index
    %c0_9 = arith.constant 0 : index
    %c0_10 = arith.constant 0 : index
    %7 = vector.load %arg6[%c0_8, %c0_9, %c0_10] : memref<1x1x32xf32, #tpu.memory_space<vmem>>, vector<1x1x32xf32>
    %8 = vector.shape_cast %7 : vector<1x1x32xf32> to vector<1x32xf32>
    %cst = arith.constant dense<0.000000e+00> : vector<32xf32>
    %9 = vector.multi_reduction <add>, %3, %cst [1] : vector<32x32xf32> to vector<32xf32>
    %10 = vector.shape_cast %9 : vector<32xf32> to vector<32x1xf32>
    %cst_11 = arith.constant 3.200000e+01 : f32
    %11 = vector.broadcast %cst_11 : f32 to vector<32x1xf32>
    %12 = arith.divf %10, %11 : vector<32x1xf32>
    %13 = vector.broadcast %12 : vector<32x1xf32> to vector<32x32xf32>
    %14 = arith.subf %3, %13 : vector<32x32xf32>
    %15 = arith.mulf %14, %14 : vector<32x32xf32>
    %cst_12 = arith.constant dense<0.000000e+00> : vector<32xf32>
    %16 = vector.multi_reduction <add>, %15, %cst_12 [1] : vector<32x32xf32> to vector<32xf32>
    %17 = vector.shape_cast %16 : vector<32xf32> to vector<32x1xf32>
    %cst_13 = arith.constant 3.200000e+01 : f32
    %18 = vector.broadcast %cst_13 : f32 to vector<32x1xf32>
    %19 = arith.divf %17, %18 : vector<32x1xf32>
    %20 = vector.broadcast %12 : vector<32x1xf32> to vector<32x32xf32>
    %21 = arith.subf %3, %20 : vector<32x32xf32>
    %cst_14 = arith.constant 9.99999974E-6 : f32
    %22 = vector.broadcast %cst_14 : f32 to vector<32x1xf32>
    %23 = arith.addf %19, %22 : vector<32x1xf32>
    %24 = math.rsqrt %23 : vector<32x1xf32>
    %25 = vector.broadcast %24 : vector<32x1xf32> to vector<32x32xf32>
    %26 = arith.mulf %21, %25 : vector<32x32xf32>
    %27 = vector.broadcast %6 : vector<1x32xf32> to vector<32x32xf32>
    %28 = arith.mulf %26, %27 : vector<32x32xf32>
    %29 = vector.broadcast %8 : vector<1x32xf32> to vector<32x32xf32>
    %30 = arith.addf %28, %29 : vector<32x32xf32>
    %31 = arith.truncf %30 : vector<32x32xf32> to vector<32x32xbf16>
    %c0_15 = arith.constant 0 : index
    %c0_16 = arith.constant 0 : index
    %c0_17 = arith.constant 0 : index
    %c0_18 = arith.constant 0 : index
    %32 = vector.load %arg7[%c0_15, %c0_16, %c0_17, %c0_18] : memref<1x6x32x16xbf16, #tpu.memory_space<vmem>>, vector<1x1x32x16xbf16>
    %33 = vector.shape_cast %32 : vector<1x1x32x16xbf16> to vector<32x16xbf16>
    %cst_19 = arith.constant dense<0.000000e+00> : vector<32x16xf32>
    %34 = tpu.matmul %31, %33, %cst_19 {dimension_numbers = #tpu.dot_dimension_numbers<[1], [0], [0], [1], [0, 0, 1, 1], [], []>} : vector<32x32xbf16>, vector<32x16xbf16>, vector<32x16xf32> -> vector<32x16xf32>
    %c0_20 = arith.constant 0 : index
    %c0_21 = arith.constant 0 : index
    %c0_22 = arith.constant 0 : index
    %c0_23 = arith.constant 0 : index
    %35 = vector.load %arg8[%c0_20, %c0_21, %c0_22, %c0_23] : memref<1x6x1x16xf32, #tpu.memory_space<vmem>>, vector<1x1x1x16xf32>
    %36 = vector.shape_cast %35 : vector<1x1x1x16xf32> to vector<1x16xf32>
    %37 = vector.broadcast %36 : vector<1x16xf32> to vector<32x16xf32>
    %38 = arith.addf %34, %37 : vector<32x16xf32>
    %39 = vector.shape_cast %38 : vector<32x16xf32> to vector<4x8x16xf32>
    %40 = arith.truncf %39 : vector<4x8x16xf32> to vector<4x8x16xbf16>
    %c0_24 = arith.constant 0 : index
    %c1 = arith.constant 1 : index
    %c0_25 = arith.constant 0 : index
    %c0_26 = arith.constant 0 : index
    %41 = vector.load %arg7[%c0_24, %c1, %c0_25, %c0_26] : memref<1x6x32x16xbf16, #tpu.memory_space<vmem>>, vector<1x1x32x16xbf16>
    %42 = vector.shape_cast %41 : vector<1x1x32x16xbf16> to vector<32x16xbf16>
    %cst_27 = arith.constant dense<0.000000e+00> : vector<32x16xf32>
    %43 = tpu.matmul %31, %42, %cst_27 {dimension_numbers = #tpu.dot_dimension_numbers<[1], [0], [0], [1], [0, 0, 1, 1], [], []>} : vector<32x32xbf16>, vector<32x16xbf16>, vector<32x16xf32> -> vector<32x16xf32>
    %c0_28 = arith.constant 0 : index
    %c1_29 = arith.constant 1 : index
    %c0_30 = arith.constant 0 : index
    %c0_31 = arith.constant 0 : index
    %44 = vector.load %arg8[%c0_28, %c1_29, %c0_30, %c0_31] : memref<1x6x1x16xf32, #tpu.memory_space<vmem>>, vector<1x1x1x16xf32>
    %45 = vector.shape_cast %44 : vector<1x1x1x16xf32> to vector<1x16xf32>
    %46 = vector.broadcast %45 : vector<1x16xf32> to vector<32x16xf32>
    %47 = arith.addf %43, %46 : vector<32x16xf32>
    %48 = vector.shape_cast %47 : vector<32x16xf32> to vector<4x8x16xf32>
    %49 = arith.truncf %48 : vector<4x8x16xf32> to vector<4x8x16xbf16>
    %50 = tpu.concatenate %40, %49 in 0 : vector<4x8x16xbf16>, vector<4x8x16xbf16> -> vector<8x8x16xbf16>
    %c0_32 = arith.constant 0 : index
    %c2 = arith.constant 2 : index
    %c0_33 = arith.constant 0 : index
    %c0_34 = arith.constant 0 : index
    %51 = vector.load %arg7[%c0_32, %c2, %c0_33, %c0_34] : memref<1x6x32x16xbf16, #tpu.memory_space<vmem>>, vector<1x1x32x16xbf16>
    %52 = vector.shape_cast %51 : vector<1x1x32x16xbf16> to vector<32x16xbf16>
    %cst_35 = arith.constant dense<0.000000e+00> : vector<32x16xf32>
    %53 = tpu.matmul %31, %52, %cst_35 {dimension_numbers = #tpu.dot_dimension_numbers<[1], [0], [0], [1], [0, 0, 1, 1], [], []>} : vector<32x32xbf16>, vector<32x16xbf16>, vector<32x16xf32> -> vector<32x16xf32>
    %c0_36 = arith.constant 0 : index
    %c2_37 = arith.constant 2 : index
    %c0_38 = arith.constant 0 : index
    %c0_39 = arith.constant 0 : index
    %54 = vector.load %arg8[%c0_36, %c2_37, %c0_38, %c0_39] : memref<1x6x1x16xf32, #tpu.memory_space<vmem>>, vector<1x1x1x16xf32>
    %55 = vector.shape_cast %54 : vector<1x1x1x16xf32> to vector<1x16xf32>
    %56 = vector.broadcast %55 : vector<1x16xf32> to vector<32x16xf32>
    %57 = arith.addf %53, %56 : vector<32x16xf32>
    %58 = vector.shape_cast %57 : vector<32x16xf32> to vector<4x8x16xf32>
    %59 = arith.truncf %58 : vector<4x8x16xf32> to vector<4x8x16xbf16>
    %c0_40 = arith.constant 0 : index
    %c3 = arith.constant 3 : index
    %c0_41 = arith.constant 0 : index
    %c0_42 = arith.constant 0 : index
    %60 = vector.load %arg7[%c0_40, %c3, %c0_41, %c0_42] : memref<1x6x32x16xbf16, #tpu.memory_space<vmem>>, vector<1x1x32x16xbf16>
    %61 = vector.shape_cast %60 : vector<1x1x32x16xbf16> to vector<32x16xbf16>
    %cst_43 = arith.constant dense<0.000000e+00> : vector<32x16xf32>
    %62 = tpu.matmul %31, %61, %cst_43 {dimension_numbers = #tpu.dot_dimension_numbers<[1], [0], [0], [1], [0, 0, 1, 1], [], []>} : vector<32x32xbf16>, vector<32x16xbf16>, vector<32x16xf32> -> vector<32x16xf32>
    %c0_44 = arith.constant 0 : index
    %c3_45 = arith.constant 3 : index
    %c0_46 = arith.constant 0 : index
    %c0_47 = arith.constant 0 : index
    %63 = vector.load %arg8[%c0_44, %c3_45, %c0_46, %c0_47] : memref<1x6x1x16xf32, #tpu.memory_space<vmem>>, vector<1x1x1x16xf32>
    %64 = vector.shape_cast %63 : vector<1x1x1x16xf32> to vector<1x16xf32>
    %65 = vector.broadcast %64 : vector<1x16xf32> to vector<32x16xf32>
    %66 = arith.addf %62, %65 : vector<32x16xf32>
    %67 = vector.shape_cast %66 : vector<32x16xf32> to vector<4x8x16xf32>
    %68 = arith.truncf %67 : vector<4x8x16xf32> to vector<4x8x16xbf16>
    %69 = tpu.concatenate %59, %68 in 0 : vector<4x8x16xbf16>, vector<4x8x16xbf16> -> vector<8x8x16xbf16>
    %c0_48 = arith.constant 0 : index
    %c4 = arith.constant 4 : index
    %c0_49 = arith.constant 0 : index
    %c0_50 = arith.constant 0 : index
    %70 = vector.load %arg7[%c0_48, %c4, %c0_49, %c0_50] : memref<1x6x32x16xbf16, #tpu.memory_space<vmem>>, vector<1x1x32x16xbf16>
    %71 = vector.shape_cast %70 : vector<1x1x32x16xbf16> to vector<32x16xbf16>
    %cst_51 = arith.constant dense<0.000000e+00> : vector<32x16xf32>
    %72 = tpu.matmul %31, %71, %cst_51 {dimension_numbers = #tpu.dot_dimension_numbers<[1], [0], [0], [1], [0, 0, 1, 1], [], []>} : vector<32x32xbf16>, vector<32x16xbf16>, vector<32x16xf32> -> vector<32x16xf32>
    %c0_52 = arith.constant 0 : index
    %c4_53 = arith.constant 4 : index
    %c0_54 = arith.constant 0 : index
    %c0_55 = arith.constant 0 : index
    %73 = vector.load %arg8[%c0_52, %c4_53, %c0_54, %c0_55] : memref<1x6x1x16xf32, #tpu.memory_space<vmem>>, vector<1x1x1x16xf32>
    %74 = vector.shape_cast %73 : vector<1x1x1x16xf32> to vector<1x16xf32>
    %75 = vector.broadcast %74 : vector<1x16xf32> to vector<32x16xf32>
    %76 = arith.addf %72, %75 : vector<32x16xf32>
    %77 = vector.shape_cast %76 : vector<32x16xf32> to vector<4x8x16xf32>
    %78 = arith.truncf %77 : vector<4x8x16xf32> to vector<4x8x16xbf16>
    %c0_56 = arith.constant 0 : index
    %c5 = arith.constant 5 : index
    %c0_57 = arith.constant 0 : index
    %c0_58 = arith.constant 0 : index
    %79 = vector.load %arg7[%c0_56, %c5, %c0_57, %c0_58] : memref<1x6x32x16xbf16, #tpu.memory_space<vmem>>, vector<1x1x32x16xbf16>
    %80 = vector.shape_cast %79 : vector<1x1x32x16xbf16> to vector<32x16xbf16>
    %cst_59 = arith.constant dense<0.000000e+00> : vector<32x16xf32>
    %81 = tpu.matmul %31, %80, %cst_59 {dimension_numbers = #tpu.dot_dimension_numbers<[1], [0], [0], [1], [0, 0, 1, 1], [], []>} : vector<32x32xbf16>, vector<32x16xbf16>, vector<32x16xf32> -> vector<32x16xf32>
    %c0_60 = arith.constant 0 : index
    %c5_61 = arith.constant 5 : index
    %c0_62 = arith.constant 0 : index
    %c0_63 = arith.constant 0 : index
    %82 = vector.load %arg8[%c0_60, %c5_61, %c0_62, %c0_63] : memref<1x6x1x16xf32, #tpu.memory_space<vmem>>, vector<1x1x1x16xf32>
    %83 = vector.shape_cast %82 : vector<1x1x1x16xf32> to vector<1x16xf32>
    %84 = vector.broadcast %83 : vector<1x16xf32> to vector<32x16xf32>
    %85 = arith.addf %81, %84 : vector<32x16xf32>
    %86 = vector.shape_cast %85 : vector<32x16xf32> to vector<4x8x16xf32>
    %87 = arith.truncf %86 : vector<4x8x16xf32> to vector<4x8x16xbf16>
    %88 = tpu.concatenate %78, %87 in 0 : vector<4x8x16xbf16>, vector<4x8x16xbf16> -> vector<8x8x16xbf16>
    "tpu.trace_start"() <{level = 10 : i32, message = "gqd,gkd->gqk"}> : () -> ()
    %cst_64 = arith.constant dense<0.000000e+00> : vector<8x8x8xf32>
    %89 = tpu.matmul %50, %69, %cst_64 {dimension_numbers = #tpu.dot_dimension_numbers<[2], [2], [1], [1], [0, 0, 0, 1, 1, 1], [0], [0]>} : vector<8x8x16xbf16>, vector<8x8x16xbf16>, vector<8x8x8xf32> -> vector<8x8x8xf32>
    "tpu.trace_stop"() : () -> ()
    %90 = vector.shape_cast %89 : vector<8x8x8xf32> to vector<2x4x8x8xf32>
    %91 = vector.shape_cast %4 : vector<4x8x8xf32> to vector<1x4x8x8xf32>
    %92 = vector.broadcast %91 : vector<1x4x8x8xf32> to vector<2x4x8x8xf32>
    %93 = arith.addf %90, %92 : vector<2x4x8x8xf32>
    %cst_65 = arith.constant dense<0xFF800000> : vector<2x4x8xf32>
    %94 = vector.multi_reduction <maximumf>, %93, %cst_65 [3] : vector<2x4x8x8xf32> to vector<2x4x8xf32>
    %95 = vector.shape_cast %94 : vector<2x4x8xf32> to vector<2x4x8x1xf32>
    %96 = vector.broadcast %95 : vector<2x4x8x1xf32> to vector<2x4x8x8xf32>
    %97 = arith.subf %93, %96 : vector<2x4x8x8xf32>
    %98 = math.exp %97 : vector<2x4x8x8xf32>
    %cst_66 = arith.constant dense<0.000000e+00> : vector<2x4x8xf32>
    %99 = vector.multi_reduction <add>, %98, %cst_66 [3] : vector<2x4x8x8xf32> to vector<2x4x8xf32>
    %100 = vector.shape_cast %99 : vector<2x4x8xf32> to vector<2x4x8x1xf32>
    %101 = tpu.reciprocal %100 {approx = true} : vector<2x4x8x1xf32> -> vector<2x4x8x1xf32>
    %102 = vector.broadcast %101 : vector<2x4x8x1xf32> to vector<2x4x8x8xf32>
    %103 = arith.mulf %98, %102 : vector<2x4x8x8xf32>
    %104 = vector.shape_cast %103 : vector<2x4x8x8xf32> to vector<8x8x8xf32>
    %105 = arith.truncf %104 : vector<8x8x8xf32> to vector<8x8x8xbf16>
    "tpu.trace_start"() <{level = 10 : i32, message = "gqk,gkd->gqd"}> : () -> ()
    %cst_67 = arith.constant dense<0.000000e+00> : vector<8x8x16xf32>
    %106 = tpu.matmul %105, %88, %cst_67 {dimension_numbers = #tpu.dot_dimension_numbers<[2], [1], [1], [2], [0, 0, 0, 1, 1, 2], [0], [0]>} : vector<8x8x8xbf16>, vector<8x8x16xbf16>, vector<8x8x16xf32> -> vector<8x8x16xf32>
    "tpu.trace_stop"() : () -> ()
    %107 = vector.extract_strided_slice %106 {offsets = [0, 0, 0], sizes = [4, 8, 16], strides = [1, 1, 1]} : vector<8x8x16xf32> to vector<4x8x16xf32>
    %108 = vector.shape_cast %107 : vector<4x8x16xf32> to vector<32x16xf32>
    %109 = arith.truncf %108 : vector<32x16xf32> to vector<32x16xbf16>
    %c0_68 = arith.constant 0 : index
    %c0_69 = arith.constant 0 : index
    %c0_70 = arith.constant 0 : index
    %c0_71 = arith.constant 0 : index
    %110 = vector.load %arg9[%c0_68, %c0_69, %c0_70, %c0_71] : memref<1x2x16x32xbf16, #tpu.memory_space<vmem>>, vector<1x1x16x32xbf16>
    %111 = vector.shape_cast %110 : vector<1x1x16x32xbf16> to vector<16x32xbf16>
    %cst_72 = arith.constant dense<0.000000e+00> : vector<32x32xf32>
    %112 = tpu.matmul %109, %111, %cst_72 {dimension_numbers = #tpu.dot_dimension_numbers<[1], [0], [0], [1], [0, 0, 1, 1], [], []>} : vector<32x16xbf16>, vector<16x32xbf16>, vector<32x32xf32> -> vector<32x32xf32>
    %113 = vector.extract_strided_slice %106 {offsets = [4, 0, 0], sizes = [4, 8, 16], strides = [1, 1, 1]} : vector<8x8x16xf32> to vector<4x8x16xf32>
    %114 = vector.shape_cast %113 : vector<4x8x16xf32> to vector<32x16xf32>
    %115 = arith.truncf %114 : vector<32x16xf32> to vector<32x16xbf16>
    %c0_73 = arith.constant 0 : index
    %c1_74 = arith.constant 1 : index
    %c0_75 = arith.constant 0 : index
    %c0_76 = arith.constant 0 : index
    %116 = vector.load %arg9[%c0_73, %c1_74, %c0_75, %c0_76] : memref<1x2x16x32xbf16, #tpu.memory_space<vmem>>, vector<1x1x16x32xbf16>
    %117 = vector.shape_cast %116 : vector<1x1x16x32xbf16> to vector<16x32xbf16>
    %cst_77 = arith.constant dense<0.000000e+00> : vector<32x32xf32>
    %118 = tpu.matmul %115, %117, %cst_77 {dimension_numbers = #tpu.dot_dimension_numbers<[1], [0], [0], [1], [0, 0, 1, 1], [], []>} : vector<32x16xbf16>, vector<16x32xbf16>, vector<32x32xf32> -> vector<32x32xf32>
    %119 = arith.addf %112, %118 : vector<32x32xf32>
    %120 = arith.addf %3, %119 : vector<32x32xf32>
    %c0_78 = arith.constant 0 : index
    %c0_79 = arith.constant 0 : index
    %c0_80 = arith.constant 0 : index
    %121 = vector.load %arg10[%c0_78, %c0_79, %c0_80] : memref<1x1x32xf32, #tpu.memory_space<vmem>>, vector<1x1x32xf32>
    %122 = vector.shape_cast %121 : vector<1x1x32xf32> to vector<1x32xf32>
    %123 = vector.broadcast %122 : vector<1x32xf32> to vector<32x32xf32>
    %124 = arith.addf %120, %123 : vector<32x32xf32>
    %c0_81 = arith.constant 0 : index
    %c0_82 = arith.constant 0 : index
    %c0_83 = arith.constant 0 : index
    %125 = vector.load %arg11[%c0_81, %c0_82, %c0_83] : memref<1x1x32xf32, #tpu.memory_space<vmem>>, vector<1x1x32xf32>
    %126 = vector.shape_cast %125 : vector<1x1x32xf32> to vector<1x32xf32>
    %c0_84 = arith.constant 0 : index
    %c0_85 = arith.constant 0 : index
    %c0_86 = arith.constant 0 : index
    %127 = vector.load %arg12[%c0_84, %c0_85, %c0_86] : memref<1x1x32xf32, #tpu.memory_space<vmem>>, vector<1x1x32xf32>
    %128 = vector.shape_cast %127 : vector<1x1x32xf32> to vector<1x32xf32>
    %cst_87 = arith.constant dense<0.000000e+00> : vector<32xf32>
    %129 = vector.multi_reduction <add>, %124, %cst_87 [1] : vector<32x32xf32> to vector<32xf32>
    %130 = vector.shape_cast %129 : vector<32xf32> to vector<32x1xf32>
    %cst_88 = arith.constant 3.200000e+01 : f32
    %131 = vector.broadcast %cst_88 : f32 to vector<32x1xf32>
    %132 = arith.divf %130, %131 : vector<32x1xf32>
    %133 = vector.broadcast %132 : vector<32x1xf32> to vector<32x32xf32>
    %134 = arith.subf %124, %133 : vector<32x32xf32>
    %135 = arith.mulf %134, %134 : vector<32x32xf32>
    %cst_89 = arith.constant dense<0.000000e+00> : vector<32xf32>
    %136 = vector.multi_reduction <add>, %135, %cst_89 [1] : vector<32x32xf32> to vector<32xf32>
    %137 = vector.shape_cast %136 : vector<32xf32> to vector<32x1xf32>
    %cst_90 = arith.constant 3.200000e+01 : f32
    %138 = vector.broadcast %cst_90 : f32 to vector<32x1xf32>
    %139 = arith.divf %137, %138 : vector<32x1xf32>
    %140 = vector.broadcast %132 : vector<32x1xf32> to vector<32x32xf32>
    %141 = arith.subf %124, %140 : vector<32x32xf32>
    %cst_91 = arith.constant 9.99999974E-6 : f32
    %142 = vector.broadcast %cst_91 : f32 to vector<32x1xf32>
    %143 = arith.addf %139, %142 : vector<32x1xf32>
    %144 = math.rsqrt %143 : vector<32x1xf32>
    %145 = vector.broadcast %144 : vector<32x1xf32> to vector<32x32xf32>
    %146 = arith.mulf %141, %145 : vector<32x32xf32>
    %147 = vector.broadcast %126 : vector<1x32xf32> to vector<32x32xf32>
    %148 = arith.mulf %146, %147 : vector<32x32xf32>
    %149 = vector.broadcast %128 : vector<1x32xf32> to vector<32x32xf32>
    %150 = arith.addf %148, %149 : vector<32x32xf32>
    %151 = arith.truncf %150 : vector<32x32xf32> to vector<32x32xbf16>
    %c0_92 = arith.constant 0 : index
    %c0_93 = arith.constant 0 : index
    %c0_94 = arith.constant 0 : index
    %152 = vector.load %arg13[%c0_92, %c0_93, %c0_94] : memref<1x32x128xbf16, #tpu.memory_space<vmem>>, vector<1x32x128xbf16>
    %153 = vector.shape_cast %152 : vector<1x32x128xbf16> to vector<32x128xbf16>
    %cst_95 = arith.constant dense<0.000000e+00> : vector<32x128xf32>
    %154 = tpu.matmul %151, %153, %cst_95 {dimension_numbers = #tpu.dot_dimension_numbers<[1], [0], [0], [1], [0, 0, 1, 1], [], []>} : vector<32x32xbf16>, vector<32x128xbf16>, vector<32x128xf32> -> vector<32x128xf32>
    %c0_96 = arith.constant 0 : index
    %c0_97 = arith.constant 0 : index
    %c0_98 = arith.constant 0 : index
    %155 = vector.load %arg14[%c0_96, %c0_97, %c0_98] : memref<1x1x128xf32, #tpu.memory_space<vmem>>, vector<1x1x128xf32>
    %156 = vector.shape_cast %155 : vector<1x1x128xf32> to vector<1x128xf32>
    %157 = vector.broadcast %156 : vector<1x128xf32> to vector<32x128xf32>
    %158 = arith.addf %154, %157 : vector<32x128xf32>
    %cst_99 = arith.constant 5.000000e-01 : f32
    %159 = vector.broadcast %cst_99 : f32 to vector<32x128xf32>
    %160 = arith.mulf %159, %158 : vector<32x128xf32>
    %cst_100 = arith.constant 0.636619746 : f32
    %161 = math.sqrt %cst_100 : f32
    %162 = arith.mulf %158, %158 : vector<32x128xf32>
    %163 = arith.mulf %158, %162 : vector<32x128xf32>
    %cst_101 = arith.constant 4.471500e-02 : f32
    %164 = vector.broadcast %cst_101 : f32 to vector<32x128xf32>
    %165 = arith.mulf %164, %163 : vector<32x128xf32>
    %166 = arith.addf %158, %165 : vector<32x128xf32>
    %167 = vector.broadcast %161 : f32 to vector<32x128xf32>
    %168 = arith.mulf %167, %166 : vector<32x128xf32>
    %169 = math.tanh %168 : vector<32x128xf32>
    %cst_102 = arith.constant 1.000000e+00 : f32
    %170 = vector.broadcast %cst_102 : f32 to vector<32x128xf32>
    %171 = arith.addf %170, %169 : vector<32x128xf32>
    %172 = arith.mulf %160, %171 : vector<32x128xf32>
    %173 = arith.truncf %172 : vector<32x128xf32> to vector<32x128xbf16>
    %c0_103 = arith.constant 0 : index
    %c0_104 = arith.constant 0 : index
    %c0_105 = arith.constant 0 : index
    %174 = vector.load %arg15[%c0_103, %c0_104, %c0_105] : memref<1x128x32xbf16, #tpu.memory_space<vmem>>, vector<1x128x32xbf16>
    %175 = vector.shape_cast %174 : vector<1x128x32xbf16> to vector<128x32xbf16>
    %cst_106 = arith.constant dense<0.000000e+00> : vector<32x32xf32>
    %176 = tpu.matmul %173, %175, %cst_106 {dimension_numbers = #tpu.dot_dimension_numbers<[1], [0], [0], [1], [0, 0, 1, 1], [], []>} : vector<32x128xbf16>, vector<128x32xbf16>, vector<32x32xf32> -> vector<32x32xf32>
    %c0_107 = arith.constant 0 : index
    %c0_108 = arith.constant 0 : index
    %c0_109 = arith.constant 0 : index
    %177 = vector.load %arg16[%c0_107, %c0_108, %c0_109] : memref<1x1x32xf32, #tpu.memory_space<vmem>>, vector<1x1x32xf32>
    %178 = vector.shape_cast %177 : vector<1x1x32xf32> to vector<1x32xf32>
    %179 = vector.broadcast %178 : vector<1x32xf32> to vector<32x32xf32>
    %180 = arith.addf %176, %179 : vector<32x32xf32>
    %181 = arith.addf %124, %180 : vector<32x32xf32>
    %c0_110 = arith.constant 0 : index
    %c0_111 = arith.constant 0 : index
    %182 = vector.load %arg17[%c0_110, %c0_111] : memref<32x32xf32, #tpu.memory_space<vmem>>, vector<32x32xf32>
    tpu.vector_store %arg17[%c0_110, %c0_111], %181 {strides = array<i32>} : memref<32x32xf32, #tpu.memory_space<vmem>>, vector<32x32xf32>,
    return
  }
  func.func @transform_0(%arg0: i32, %arg1: i32) -> (i32, i32) {
    %c0_i32 = arith.constant 0 : i32
    %c0_i32_0 = arith.constant 0 : i32
    return %arg0, %c0_i32 : i32, i32
  }
  func.func @transform_1(%arg0: i32, %arg1: i32) -> (i32, i32) {
    %c0_i32 = arith.constant 0 : i32
    %c0_i32_0 = arith.constant 0 : i32
    return %arg0, %c0_i32 : i32, i32
  }
  func.func @transform_2(%arg0: i32, %arg1: i32) -> (i32, i32) {
    %c0_i32 = arith.constant 0 : i32
    %c0_i32_0 = arith.constant 0 : i32
    %c0_i32_1 = arith.constant 0 : i32
    return %c0_i32, %c0_i32_0 : i32, i32
  }
  func.func @transform_3(%arg0: i32, %arg1: i32) -> (i32, i32, i32) {
    %c0_i32 = arith.constant 0 : i32
    %c0_i32_0 = arith.constant 0 : i32
    %c0_i32_1 = arith.constant 0 : i32
    return %arg1, %c0_i32, %c0_i32_0 : i32, i32, i32
  }
  func.func @transform_4(%arg0: i32, %arg1: i32) -> (i32, i32, i32) {
    %c0_i32 = arith.constant 0 : i32
    %c0_i32_0 = arith.constant 0 : i32
    %c0_i32_1 = arith.constant 0 : i32
    return %arg1, %c0_i32, %c0_i32_0 : i32, i32, i32
  }
  func.func @transform_5(%arg0: i32, %arg1: i32) -> (i32, i32, i32, i32) {
    %c0_i32 = arith.constant 0 : i32
    %c0_i32_0 = arith.constant 0 : i32
    %c0_i32_1 = arith.constant 0 : i32
    %c0_i32_2 = arith.constant 0 : i32
    return %arg1, %c0_i32, %c0_i32_0, %c0_i32_1 : i32, i32, i32, i32
  }
  func.func @transform_6(%arg0: i32, %arg1: i32) -> (i32, i32, i32, i32) {
    %c0_i32 = arith.constant 0 : i32
    %c0_i32_0 = arith.constant 0 : i32
    %c0_i32_1 = arith.constant 0 : i32
    %c0_i32_2 = arith.constant 0 : i32
    return %arg1, %c0_i32, %c0_i32_0, %c0_i32_1 : i32, i32, i32, i32
  }
  func.func @transform_7(%arg0: i32, %arg1: i32) -> (i32, i32, i32, i32) {
    %c0_i32 = arith.constant 0 : i32
    %c0_i32_0 = arith.constant 0 : i32
    %c0_i32_1 = arith.constant 0 : i32
    %c0_i32_2 = arith.constant 0 : i32
    return %arg1, %c0_i32, %c0_i32_0, %c0_i32_1 : i32, i32, i32, i32
  }
  func.func @transform_8(%arg0: i32, %arg1: i32) -> (i32, i32, i32) {
    %c0_i32 = arith.constant 0 : i32
    %c0_i32_0 = arith.constant 0 : i32
    %c0_i32_1 = arith.constant 0 : i32
    return %arg1, %c0_i32, %c0_i32_0 : i32, i32, i32
  }
  func.func @transform_9(%arg0: i32, %arg1: i32) -> (i32, i32, i32) {
    %c0_i32 = arith.constant 0 : i32
    %c0_i32_0 = arith.constant 0 : i32
    %c0_i32_1 = arith.constant 0 : i32
    return %arg1, %c0_i32, %c0_i32_0 : i32, i32, i32
  }
  func.func @transform_10(%arg0: i32, %arg1: i32) -> (i32, i32, i32) {
    %c0_i32 = arith.constant 0 : i32
    %c0_i32_0 = arith.constant 0 : i32
    %c0_i32_1 = arith.constant 0 : i32
    return %arg1, %c0_i32, %c0_i32_0 : i32, i32, i32
  }
  func.func @transform_11(%arg0: i32, %arg1: i32) -> (i32, i32, i32) {
    %c0_i32 = arith.constant 0 : i32
    %c0_i32_0 = arith.constant 0 : i32
    %c0_i32_1 = arith.constant 0 : i32
    return %arg1, %c0_i32, %c0_i32_0 : i32, i32, i32
  }
  func.func @transform_12(%arg0: i32, %arg1: i32) -> (i32, i32, i32) {
    %c0_i32 = arith.constant 0 : i32
    %c0_i32_0 = arith.constant 0 : i32
    %c0_i32_1 = arith.constant 0 : i32
    return %arg1, %c0_i32, %c0_i32_0 : i32, i32, i32
  }
  func.func @transform_13(%arg0: i32, %arg1: i32) -> (i32, i32, i32) {
    %c0_i32 = arith.constant 0 : i32
    %c0_i32_0 = arith.constant 0 : i32
    %c0_i32_1 = arith.constant 0 : i32
    return %arg1, %c0_i32, %c0_i32_0 : i32, i32, i32
  }
  func.func @transform_14(%arg0: i32, %arg1: i32) -> (i32, i32, i32) {
    %c0_i32 = arith.constant 0 : i32
    %c0_i32_0 = arith.constant 0 : i32
    %c0_i32_1 = arith.constant 0 : i32
    return %arg1, %c0_i32, %c0_i32_0 : i32, i32, i32
  }
  func.func @transform_15(%arg0: i32, %arg1: i32) -> (i32, i32) {
    %c0_i32 = arith.constant 0 : i32
    %c0_i32_0 = arith.constant 0 : i32
    return %arg0, %c0_i32 : i32, i32
  }
}

</mosaic_0001>

<bundles_post_ra>
// kernel: tpu_custom_call.1
= control target key start
LH: loop header
LB: loop body
LE: loop exit
PB: predicated region body
PF: predicated region fallthrough
CT: control target
= control target key end

     0   :  { %s3954_s0 = inlined_call_operand.vmem [shape: s32[4,8], index: 0, kind: input, shape index: {}]   ;;  %s3955_s1 = inlined_call_operand.vmem [shape: f32[32,32], index: 1, kind: input, shape index: {}]   ;;  %s3956_s2 = inlined_call_operand.vmem [shape: f32[8,32], index: 2, kind: input, shape index: {}]   ;;  %s3957_s3 = inlined_call_operand.vmem [shape: f32[2,1,32], index: 3, kind: input, shape index: {}]   ;;  %s3958_s4 = inlined_call_operand.vmem [shape: f32[2,1,32], index: 4, kind: input, shape index: {}]   ;;  %s3959_s5 = inlined_call_operand.vmem [shape: bf16[2,6,32,16], index: 5, kind: input, shape index: {}]   ;;  %s3960_s6 = inlined_call_operand.vmem [shape: f32[2,6,1,16], index: 6, kind: input, shape index: {}]   ;;  %s3961_s7 = inlined_call_operand.vmem [shape: bf16[2,2,16,32], index: 7, kind: input, shape index: {}]   ;;  %s3962_s8 = inlined_call_operand.vmem [shape: f32[2,1,32], index: 8, kind: input, shape index: {}]   ;;  %s3963_s9 = inlined_call_operand.vmem [shape: f32[2,1,32], index: 9, kind: input, shape index: {}]   ;;  %s3964_s10 = inlined_call_operand.vmem [shape: f32[2,1,32], index: 10, kind: input, shape index: {}]   ;;  %s3965_s11 = inlined_call_operand.vmem [shape: bf16[2,32,128], index: 11, kind: input, shape index: {}]   ;;  %s3966_s12 = inlined_call_operand.vmem [shape: f32[2,1,128], index: 12, kind: input, shape index: {}]   ;;  %s3967_s13 = inlined_call_operand.vmem [shape: bf16[2,128,32], index: 13, kind: input, shape index: {}]   ;;  %s3968_s14 = inlined_call_operand.vmem [shape: f32[2,1,32], index: 14, kind: input, shape index: {}]   ;;  %s3969_s15 = inlined_call_operand.hbm [shape: f32[32,32], index: 15, kind: output, shape index: {}]  }
   0x1   :  { %3974 = sst [smem:[#allocation10_spill]] %s3954_s0 }
   0x2   :  { %3975 = sst [smem:[#allocation11_spill]] %s3957_s3 }
   0x3   :  { %3976 = sst [smem:[#allocation12_spill]] %s3958_s4 }
   0x4   :  { %3977 = sst [smem:[#allocation13_spill]] %s3959_s5 }
   0x5   :  { %3978 = sst [smem:[#allocation14_spill]] %s3961_s7 }
   0x6   :  { %3979 = sst [smem:[#allocation15_spill]] %s3969_s15 }
   0x7   :  { %20 = vsyncpa [#allocation4], 0  ;;  %s3526_s18 = smov 0   ;;  %s3528_s19 = smov 0  }
   0x8   :  { %s3530_s20 = smov 0  }
   0x9 LB: > { %3980 = sst [smem:[#allocation6_spill]] %s3432_s19  ;;  %s35_s22 = sadd.s32 1, %s3432_s19  ;;  %s3436_s20 = sphi %s3530_s20, %s26_s20   ;;  %s3432_s19 = sphi %s3528_s19, %s4002_s19   ;;  %s3428_s18 = sphi %s3526_s18, %s4001_s18  }
   0xa   : > { %3981 = sst [smem:[#allocation7_spill]] %s3436_s20  ;;  %p36_p0 = scmp.ge.s32.totalorder %s35_s22, 2 }
   0xb   : > { %p2882_p1 = scmp.ge.s32.totalorder %s3436_s20, 1  ;;  %p565_p2 = scmp.lt.s32.totalorder %s3436_s20, 3 }
   0xc   : > { %s4004_s22 = smov (%p36_p0, %s35_s22), 0 }
   0xd   : > { %3982 = sst [smem:[#allocation8_spill]] %s4004_s22  ;;  %p566_p3 = pnand %p2882_p1, %p565_p2 }
   0xf   : > { %569 = sbr.rel (%p566_p3) target bundleno = 2421 (0x975), region = 80 }
  0x16   : > { %p667_p4 = scmp.lt.s32.totalorder %s3428_s18, 1  ;;  %s3985_s7 = sld [smem:[#allocation14_spill]] }
  0x17   : > { %s3987_s5 = sld [smem:[#allocation13_spill]]  ;;  %p2890_p5 = scmp.ne.s32.totalorder %s3428_s18, 0 }
  0x18   : > { %s3549_s23 = scalar_select %p667_p4, %s3428_s18, 1 }
  0x19   : > { %v718_v0 = vld [vmem:[%s3955_s1] sm:$0xff] (!%p2890_p5)  ;;  %vm727_vm0 = vcmask (!%p2890_p5), 261120   ;;  %v719_v2 = vld [vmem:[%s3955_s1 + $0x8] sm:$0xff] (!%p2890_p5)  ;;  %v733_v3 = vlaneseq (!%p2890_p5)  ;;  %v720_v6 = vld [vmem:[%s3955_s1 + $0x10] sm:$0xff] (!%p2890_p5)  ;;  %s3988_s24 = sld [smem:[#allocation10_spill]] (!%p2890_p5)  ;;  %v3439_v15 = vmov (!%p2890_p5), 0  }
  0x1a   : > { %s3260_s30 = smul.u32 96, %s3549_s23  ;;  %s2993_s16 = sshll.u32 %s3549_s23, 4  ;;  %v722_v1 = vld [vmem:[%s3956_s2] sm:$0xff] (!%p2890_p5)  ;;  %v721_v7 = vld [vmem:[%s3955_s1 + $0x18] sm:$0xff] (!%p2890_p5)  ;;  %v3438_v12 = vmov (!%p2890_p5), 1966171168  }
  0x1b   : > { %s3261_s17 = smul.u32 6, %s3549_s23  ;;  %s692_s21 = scalar_lea.vmem %s3963_s9, %s3549_s23  ;;  %v723_v4 = vadd.f32 (!%p2890_p5), %v722_v1, %v718_v0  ;;  %v724_v5 = vadd.f32 (!%p2890_p5), %v722_v1, %v719_v2  ;;  %v725_v9 = vadd.f32 (!%p2890_p5), %v722_v1, %v720_v6  ;;  %v726_v10 = vadd.f32 (!%p2890_p5), %v722_v1, %v721_v7 }
  0x1c   : > { %s3565_s25 = scalar_lea.vmem %s3985_s7, %s2993_s16  ;;  %s703_s26 = scalar_lea.vmem %s3966_s12, %s3549_s23  ;;  %v734_v11 = vshrl.u32 (!%p2890_p5), %v733_v3, 7  ;;  %v741_v13 = vunpack.c.l.s4 (!%p2890_p5), %v3438_v12  ;;  %v736_v19 = vand.u32 (!%p2890_p5), 127, %v733_v3  ;;  %vm802_vm6 = vcmask (!%p2890_p5), 64512  }
  0x1d   : > { %3986 = sst [smem:[#allocation9_spill]] %s3565_s25  ;;  %s3570_s15 = scalar_lea.vmem %s3987_s5, %s3260_s30  ;;  %728 = vst.msk [vmem:[#allocation3] sm:$0xff] (!%p2890_p5), %vm727_vm0, %v723_v4  ;;  %729 = vst.msk [vmem:[#allocation3 + $0x8] sm:$0xff] (!%p2890_p5), %vm727_vm0, %v724_v5  ;;  %v3440_v33 = vmov (!%p2890_p5), -1e+09  }
  0x1e   : > { %s3579_s28 = scalar_lea.vmem %s3960_s6, %s3261_s17  ;;  %s695_s25 = scalar_lea.vmem %s3964_s10, %s3549_s23  ;;  %730 = vst.msk [vmem:[#allocation3 + $0x10] sm:$0xff] (!%p2890_p5), %vm727_vm0, %v725_v9  ;;  %731 = vst.msk [vmem:[#allocation3 + $0x18] sm:$0xff] (!%p2890_p5), %vm727_vm0, %v726_v10  ;;  %v742_v14 = vunpack.c.0.s8 (!%p2890_p5), %v741_v13  ;;  %v776_v21 = vsub.s32 (!%p2890_p5), 0, %v734_v11  ;;  %vm737_vm3 = vcmp.le.s32.totalorder (!%p2890_p5), %v736_v19, %v734_v11 }
  0x1f   : > { %s3592_s30 = scalar_lea.vmem %s3965_s11, %s2993_s16  ;;  %s2995_s3 = sshll.u32 %s3549_s23, 6  ;;  %v732_v8 = vld [vmem:[%s3988_s24] sm:$0xf] (!%p2890_p5) }
  0x20   : > { %s3602_s5 = scalar_lea.vmem %s3967_s13, %s2995_s3  ;;  %s711_s7 = scalar_lea.vmem %s3968_s14, %s3549_s23  ;;  %vm738_vm1 = vcmp.ne.s32.totalorder (!%p2890_p5), %v732_v8, 0  ;;  %v745_v17 = vsub.s32 (!%p2890_p5), %v742_v14, %v734_v11 }
  0x21   : > { %717 = sbr.rel (%p2890_p5) target bundleno = 50 (0x32), region = 84  ;;  %v739_v16 = vsel (!%p2890_p5), %vm738_vm1, 1, %v3439_v15 }
  0x22   : > { %v746_v18 = vrot.slane (!%p2890_p5), %v739_v16, %v745_v17 }
  0x24   : > { %v754_v20 = vrot.slane (!%p2890_p5), %v746_v18, %v745_v17  ;;  %v747_v22 = vcombine.high (!%p2890_p5), %v746_v18, %v746_v18 }
  0x26   : > { %vm764_vm2 = vcmp.ne.s32.totalorder (!%p2890_p5), %v754_v20, 0  ;;  %v761_v23 = vrot.slane (!%p2890_p5), %v747_v22, %v745_v17  ;;  %v762_v24 = vcombine.high (!%p2890_p5), %v754_v20, %v754_v20 }
  0x27   : > { %v770_v25 = vsel (!%p2890_p5), %vm764_vm2, 1, %v3439_v15 }
  0x28   : > { %v777_v26 = vrot.slane %v770_v25, %v776_v21  ;;  %vm765_vm4 = vcmp.ne.s32.totalorder %v761_v23, 0  ;;  %vm766_vm5 = vcmp.ne.s32.totalorder %v762_v24, 0  ;;  %v763_v27 = vcombine.high %v761_v23, %v761_v23 }
  0x29   : > { %v771_v28 = vsel %vm765_vm4, 1, %v3439_v15  ;;  %v772_v29 = vsel %vm766_vm5, 1, %v3439_v15 }
  0x2a   : > { %vm790_vm7 = vcmp.eq.s32.totalorder %v777_v26, 1  ;;  %v781_v30 = vrot.slane %v771_v28, %v776_v21  ;;  %v785_v31 = vrot.slane %v772_v29, %v776_v21  ;;  %vm767_vm8 = vcmp.ne.s32.totalorder %v763_v27, 0 }
  0x2b   : > { %vm794_vm9 = vmand %vm737_vm3, %vm790_vm7  ;;  %v773_v32 = vsel %vm767_vm8, 1, %v3439_v15 }
  0x2c   : > { %v798_v34 = vsel %vm794_vm9, 0.0, %v3440_v33  ;;  %vm791_vm10 = vcmp.eq.s32.totalorder %v781_v30, 1  ;;  %vm792_vm11 = vcmp.eq.s32.totalorder %v785_v31, 1  ;;  %v789_v35 = vrot.slane %v773_v32, %v776_v21 }
  0x2d   : > { %803 = vst.msk [vmem:[#allocation2] sm:$0xff] %vm802_vm6, %v798_v34  ;;  %vm795_vm12 = vmand %vm737_vm3, %vm791_vm10 }
  0x2e   : > { %v799_v36 = vsel %vm795_vm12, 0.0, %v3440_v33  ;;  %vm796_vm13 = vmand %vm737_vm3, %vm792_vm11  ;;  %vm793_vm14 = vcmp.eq.s32.totalorder %v789_v35, 1 }
  0x2f   : > { %804 = vst.msk [vmem:[#allocation2 + $0x8] sm:$0xff] %vm802_vm6, %v799_v36  ;;  %v800_v37 = vsel %vm796_vm13, 0.0, %v3440_v33  ;;  %vm797_vm15 = vmand %vm737_vm3, %vm793_vm14 }
  0x30   : > { %805 = vst.msk [vmem:[#allocation2 + $0x10] sm:$0xff] %vm802_vm6, %v800_v37  ;;  %v801_v38 = vsel %vm797_vm15, 0.0, %v3440_v33 }
  0x31   : > { %806 = vst.msk [vmem:[#allocation2 + $0x18] sm:$0xff] %vm802_vm6, %v801_v38 }
  0x32 PF: > { %v807_v39 = vld [vmem:[#allocation3] sm:$0xff]  ;;  %vm817_vm0 = vcmask 261120   ;;  %v809_v40 = vld [vmem:[#allocation3 + $0x10] sm:$0xff]  ;;  %v808_v41 = vld [vmem:[#allocation3 + $0x8] sm:$0xff]  ;;  %s3989_s22 = sld [smem:[#allocation11_spill]]  ;;  %s3991_s17 = sld [smem:[#allocation12_spill]] }
  0x33   : > { %v818_v42 = vsel %vm817_vm0, %v807_v39, 0.0  ;;  %v824_v43 = vsel %vm817_vm0, %v809_v40, 0.0  ;;  %v810_v44 = vld [vmem:[#allocation3 + $0x18] sm:$0xff]  ;;  %v821_v45 = vsel %vm817_vm0, %v808_v41, 0.0  ;;  %v3300_v3 = vld [vmem:[%s3570_s15] sm:$0xff]   ;;  %v3301_v4 = vld [vmem:[%s3570_s15 + $0x30] sm:$0xff]   ;;  %s3994_s4 = scalar_lea.vmem %s3962_s8, %s3549_s23 }
  0x34   : > { %819 = vadd.xlane.f32.xlu0 %v818_v42  ;;  %825 = vadd.xlane.f32.xlu1 %v824_v43  ;;  %v827_v46 = vsel %vm817_vm0, %v810_v44, 0.0  ;;  %v3302_v5 = vld [vmem:[%s3570_s15 + $0x8] sm:$0xff]   ;;  %v3303_v6 = vld [vmem:[%s3570_s15 + $0x38] sm:$0xff]   ;;  %v3304_v7 = vld [vmem:[%s3570_s15 + $0x10] sm:$0xff]   ;;  %vm3442_vm1 = vmmov 0   ;;  %vm1842_vm2 = vcmask 1043456  }
  0x35   : > { %3072 = vmatprep.subr.bf16.mxu0 %v3300_v3  ;;  %3096 = vmatprep.subr.bf16.mxu1 %v3301_v4  ;;  %v3305_v8 = vld [vmem:[%s3570_s15 + $0x50] sm:$0xff]   ;;  %v3307_v42 = vld [vmem:[%s3570_s15 + $0x58] sm:$0xff]   ;;  %v3308_v43 = vld [vmem:[%s3570_s15 + $0x20] sm:$0xff]   ;;  %vm1365_vm3 = vcmask 130048   ;;  %vm1742_vm4 = vcmask 64512   ;;  %s3995_s19 = sld [smem:[#allocation7_spill]] }
  0x36   : > { %3073 = vmatpush3.bf16.msra.mxu0 %v3300_v3  ;;  %3097 = vmatpush3.bf16.msra.mxu1 %v3301_v4 }
  0x37   : > { %3074 = vmatprep.subr.bf16.mxu0 %v3302_v5  ;;  %3098 = vmatprep.subr.bf16.mxu1 %v3303_v6 }
  0x38   : > { %822 = vadd.xlane.f32.xlu0 %v821_v45  ;;  %828 = vadd.xlane.f32.xlu1 %v827_v46  ;;  %s3990_s0 = scalar_lea.vmem %s3989_s22, %s3549_s23  ;;  %s3992_s18 = scalar_lea.vmem %s3991_s17, %s3549_s23  ;;  %v3310_v45 = vld [vmem:[%s3570_s15 + $0x40] sm:$0xff]   ;;  %v3311_v46 = vld [vmem:[%s3570_s15 + $0x48] sm:$0xff]  }
  0x39   : > { %v2891_v23 = vld [vmem:[%s3990_s0] ss:$0 sm:$0xff]  ;;  %s3443_s22 = smov [#allocation3]  }
  0x3a   : > { %3075 = vmatpush3.bf16.msra.mxu0 %v3302_v5  ;;  %3099 = vmatpush3.bf16.msra.mxu1 %v3303_v6  ;;  %v2892_v28 = vld [vmem:[%s3992_s18] ss:$0 sm:$0xff]  ;;  %s2683_s0 = sshll.u32 %s3443_s22, 4  ;;  %s2684_s0 = int_to_ptr.vmem [resolvable:$true] %s2683_s0 }
  0x3b   : > { %3080 = vmatprep.subr.bf16.mxu0 %v3304_v7  ;;  %3112 = vmatprep.subr.bf16.mxu1 %v3305_v8  ;;  %s3996_s23 = sadd.s32 4294967295, %s3995_s19   ;;  %s3384_s20 = scalar_lea.vmem %s2684_s0, 512 }
  0x3c   : > { %p3915_p6 = scmp.eq.s32.totalorder %s3996_s23, 1  ;;  %p3385_p7 = scmp.ne.s32.totalorder %s2684_s0, %s3384_s20 }
  0x3d   : > { %p3391_p10 = scmp.lt.s32.totalorder %s2684_s0, %s2684_s0  ;;  %p3392_p11 = scmp.lt.s32.totalorder %s3384_s20, %s3384_s20 }
  0x3e   : > { %p3386_p8 = pnand %p3385_p7, %p3915_p6 }
  0x3f   : > { %p3393_p12 = por %p3392_p11, %p3391_p10 }
  0x40   : > { %p3387_p9 = pneg %p3386_p8 }
  0x42   : > { %p3394_p13 = pnand %p3393_p12, %p3387_p9 }
  0xc1   : > { %v820_v47 = vpop.xlane.xlu0 %819  ;;  %v826_v48 = vpop.xlane.xlu1 %825 }
  0xc2   : > { %v831_v49 = vmul.f32 0.03125, %v820_v47  ;;  %v833_v50 = vmul.f32 0.03125, %v826_v48  ;;  %v3441_v47 = vmov 0.0  }
  0xc4   : > { %v835_v51 = vsub.f32 %v807_v39, %v831_v49  ;;  %v837_v52 = vsub.f32 %v809_v40, %v833_v50 }
  0xc5   : > { %v823_v53 = vpop.xlane.xlu0 %822  ;;  %v829_v54 = vpop.xlane.xlu1 %828 }
  0xc6   : > { %v832_v55 = vmul.f32 0.03125, %v823_v53  ;;  %v834_v56 = vmul.f32 0.03125, %v829_v54  ;;  %v839_v57 = vmul.f32 %v835_v51, %v835_v51  ;;  %v841_v58 = vmul.f32 %v837_v52, %v837_v52 }
  0xc8   : > { %v836_v59 = vsub.f32 %v808_v41, %v832_v55  ;;  %v838_v60 = vsub.f32 %v810_v44, %v834_v56  ;;  %v843_v61 = vsel %vm817_vm0, %v839_v57, 0.0  ;;  %v849_v62 = vsel %vm817_vm0, %v841_v58, 0.0  ;;  %v3306_v41 = vld [vmem:[%s3570_s15 + $0x18] sm:$0xff]   ;;  %v3309_v44 = vld [vmem:[%s3570_s15 + $0x28] sm:$0xff]   ;;  %v2943_v56 = vld [vmem:[%s3579_s28 + $0x5] ss:$0 sm:$0xff] }
  0xc9   : > { %844 = vadd.xlane.f32.xlu0 %v843_v61  ;;  %s3993_s15 = sld [smem:[#allocation9_spill]] }
  0xca   : > { %v840_v63 = vmul.f32 %v836_v59, %v836_v59  ;;  %v842_v0 = vmul.f32 %v838_v60, %v838_v60 }
  0xcc   : > { %v846_v1 = vsel %vm817_vm0, %v840_v63, 0.0  ;;  %v852_v2 = vsel %vm817_vm0, %v842_v0, 0.0 }
  0xcd   : > { %850 = vadd.xlane.f32.xlu0 %v849_v62  ;;  %847 = vadd.xlane.f32.xlu1 %v846_v1 }
  0xd1   : > { %853 = vadd.xlane.f32.xlu1 %v852_v2 }
 0x156   : > { %v845_v9 = vpop.xlane.xlu0 %844 }
 0x157   : > { %v855_v10 = vmul.f32 0.03125, %v845_v9 }
 0x159   : > { %v859_v11 = vadd.f32 1e-05, %v855_v10 }
 0x15a   : > { %v848_v12 = vpop.xlane.xlu1 %847  ;;  %v851_v13 = vpop.xlane.xlu0 %850 }
 0x15b   : > { %3324 = vrsqrt.f32 %v859_v11  ;;  %v856_v14 = vmul.f32 0.03125, %v848_v12  ;;  %v857_v15 = vmul.f32 0.03125, %v851_v13  ;;  %v2913_v11 = vld [vmem:[%s3579_s28 + $0x2] ss:$0 sm:$0xff] }
 0x15d   : > { %v860_v16 = vadd.f32 1e-05, %v856_v14  ;;  %v861_v17 = vadd.f32 1e-05, %v857_v15 }
 0x15e   : > { %v854_v18 = vpop.xlane.xlu1 %853 }
 0x15f   : > { %3326 = vrsqrt.f32 %v860_v16  ;;  %v858_v19 = vmul.f32 0.03125, %v854_v18 }
 0x160   : > { %3328 = vrsqrt.f32 %v861_v17 }
 0x161   : > { %v862_v20 = vadd.f32 1e-05, %v858_v19 }
 0x163   : > { %3330 = vrsqrt.f32 %v862_v20 }
 0x165   : > { %v3325_v21 = vpop.eup %3324 }
 0x166   : > { %v867_v22 = vmul.f32 %v3325_v21, %v835_v51  ;;  %v2893_v21 = vld [vmem:[%s3579_s28] ss:$0 sm:$0xff] }
 0x168   : > { %v877_v26 = vmul.f32 %v2891_v23, %v867_v22 }
 0x169   : > { %v3327_v24 = vpop.eup %3326 }
 0x16a   : > { %v3329_v25 = vpop.eup %3328  ;;  %v868_v27 = vmul.f32 %v3327_v24, %v836_v59  ;;  %v887_v32 = vadd.f32 %v2892_v28, %v877_v26 }
 0x16b   : > { %v869_v29 = vmul.f32 %v3329_v25, %v837_v52  ;;  %v3722_v25 = vld [vmem:[%s3579_s28 + $0x4] ss:$0 sm:$0xff] }
 0x16c   : > { %v878_v30 = vmul.f32 %v2891_v23, %v868_v27 }
 0x16d   : > { %v3331_v31 = vpop.eup %3330  ;;  %v879_v34 = vmul.f32 %v2891_v23, %v869_v29 }
 0x16e   : > { %v888_v33 = vadd.f32 %v2892_v28, %v878_v30  ;;  %v870_v35 = vmul.f32 %v3331_v31, %v838_v60 }
 0x16f   : > { %v889_v38 = vadd.f32 %v2892_v28, %v879_v34 }
 0x170   : > { %v880_v36 = vmul.f32 %v2891_v23, %v870_v35  ;;  %v891_v37 = vpack.c.bf16 %v888_v33, %v887_v32  ;;  %v2923_v35 = vld [vmem:[%s3579_s28 + $0x3] ss:$0 sm:$0xff] }
 0x172   : > { %v890_v39 = vadd.f32 %v2892_v28, %v880_v36  ;;  %3076 = vmatprep.mubr.msk.bf16.mxu0 %vm817_vm0, %v891_v37  ;;  %3100 = vmatprep.mubr.msk.bf16.mxu1 %vm817_vm0, %v891_v37 }
 0x174   : > { %v892_v40 = vpack.c.bf16 %v890_v39, %v889_v38 }
 0x176   : > { %3077 = vmatmul.mubr.msk.bf16.vlgmr.msra.gmra.mrb[0].mxu0 %vm817_vm0, %v892_v40  ;;  %3101 = vmatmul.mubr.msk.bf16.vlgmr.msra.gmra.mrb[0].mxu1 %vm817_vm0, %v892_v40 }
 0x177   : > { %3081 = vmatpush3.bf16.msra.mxu0 %v3304_v7  ;;  %3084 = vmatprep.mubr.msk.bf16.mxu0 %vm817_vm0, %v891_v37 }
 0x178   : > { %3113 = vmatpush3.bf16.msra.mxu1 %v3305_v8  ;;  %3116 = vmatprep.mubr.msk.bf16.mxu1 %vm817_vm0, %v891_v37 }
 0x179   : > { %3082 = vmatprep.subr.bf16.mxu0 %v3306_v41  ;;  %3114 = vmatprep.subr.bf16.mxu1 %v3307_v42 }
 0x17b   : > { %3083 = vmatpush3.bf16.msra.mxu0 %v3306_v41 }
 0x17c   : > { %3115 = vmatpush3.bf16.msra.mxu1 %v3307_v42  ;;  %3088 = vmatprep.subr.bf16.mxu0 %v3308_v43 }
 0x17d   : > { %3126 = vmatprep.subr.bf16.mxu1 %v3441_v47 }
 0x17e   : > { %3085 = vmatmul.mubr.msk.bf16.vlgmr.msra.gmra.mrb[4].mxu0 %vm817_vm0, %v892_v40 }
 0x17f   : > { %3117 = vmatmul.mubr.msk.bf16.vlgmr.msra.gmra.mrb[4].mxu1 %vm817_vm0, %v892_v40  ;;  %3089 = vmatpush3.bf16.msra.mxu0 %v3308_v43 }
 0x180   : > { %3092 = vmatprep.mubr.msk.bf16.mxu0 %vm817_vm0, %v891_v37  ;;  %3090 = vmatprep.subr.bf16.mxu0 %v3309_v44 }
 0x181   : > { %3128 = vmatprep.mubr.msk.bf16.mxu1 %vm3442_vm1, %v3441_v47 }
 0x183   : > { %3091 = vmatpush3.bf16.msra.mxu0 %v3309_v44 }
 0x184   : > { %3104 = vmatprep.subr.bf16.mxu0 %v3310_v45 }
 0x186   : > { %3093 = vmatmul.mubr.msk.bf16.vlgmr.msra.gmra.mrb[8].mxu0 %vm817_vm0, %v892_v40 }
 0x187   : > { %3105 = vmatpush3.bf16.msra.mxu0 %v3310_v45  ;;  %3108 = vmatprep.mubr.msk.bf16.mxu0 %vm817_vm0, %v891_v37 }
 0x188   : > { %3106 = vmatprep.subr.bf16.mxu0 %v3311_v46 }
 0x18b   : > { %3107 = vmatpush3.bf16.msra.mxu0 %v3311_v46 }
 0x18c   : > { %3120 = vmatprep.subr.bf16.mxu0 %v3441_v47 }
 0x18e   : > { %3109 = vmatmul.mubr.msk.bf16.vlgmr.msra.gmra.mrb[12].mxu0 %vm817_vm0, %v892_v40 }
 0x18f   : > { %3122 = vmatprep.mubr.msk.bf16.mxu0 %vm3442_vm1, %v3441_v47 }
 0x249   : > { %v3687_v48 = vpop.f32.mrb[0].mxu0  ;;  %v3689_v49 = vpop.f32.mrb[0].mxu1 }
 0x24a   : > { %v956_v50 = vpop.f32.mrb[1].mxu0  ;;  %v1190_v51 = vpop.f32.mrb[1].mxu1 }
 0x24b   : > { %v3691_v52 = vpop.f32.mrb[2].mxu0  ;;  %v3693_v53 = vpop.f32.mrb[2].mxu1  ;;  %v957_v26 = vadd.f32 %v2893_v21, %v956_v50  ;;  %v1191_v43 = vadd.f32 %v2923_v35, %v1190_v51  ;;  %v965_v50 = vadd.f32 %v3687_v48, %v2893_v21  ;;  %v2903_v48 = vld [vmem:[%s3579_s28 + $0x1] ss:$0 sm:$0xff] }
 0x24c   : > { %v959_v54 = vpop.f32.mrb[3].mxu0  ;;  %v3695_v55 = vpop.f32.mrb[3].mxu1 }
 0x24d   : > { %v960_v32 = vadd.f32 %v2893_v21, %v959_v54  ;;  %v971_v39 = vpack.c.bf16 %v957_v26, %v957_v26  ;;  %v1194_v54 = vadd.f32 %v2923_v35, %v3695_v55  ;;  %v1205_v51 = vpack.c.bf16 %v1191_v43, %v1191_v43 }
 0x24e   : > { %v1199_v55 = vadd.f32 %v3689_v49, %v2923_v35 }
 0x24f   : > { %v972_v44 = vpack.c.bf16 %v960_v32, %v960_v32 }
 0x250   : > { %v1207_v49 = vpack.c.bf16 %v1199_v55, %v1199_v55 }
 0x251   : > { %v3698_v57 = vpop.f32.mrb[4].mxu0 }
 0x252   : > { %v3118_v58 = vpop.f32.mrb[4].mxu1  ;;  %v3700_v59 = vpop.f32.mrb[5].mxu0 }
 0x253   : > { %v1355_v60 = vadd.f32 %v3118_v58, %v2943_v56  ;;  %v1346_v61 = vpop.f32.mrb[5].mxu1  ;;  %v3702_v62 = vpop.f32.mrb[6].mxu0  ;;  %v968_v58 = vadd.f32 %v3691_v52, %v2893_v21  ;;  %v812_v21 = vld [vmem:[#allocation2 + $0x8] sm:$0xff] }
 0x254   : > { %v1347_v63 = vadd.f32 %v2943_v56, %v1346_v61  ;;  %v3119_v0 = vpop.f32.mrb[6].mxu1  ;;  %v3704_v1 = vpop.f32.mrb[7].mxu0  ;;  %v1206_v61 = vpack.c.bf16 %v1194_v54, %v1194_v54 }
 0x255   : > { %v1363_v2 = vpack.c.bf16 %v1355_v60, %v1355_v60  ;;  %v1358_v3 = vadd.f32 %v3119_v0, %v2943_v56  ;;  %v1349_v4 = vpop.f32.mrb[7].mxu1  ;;  %v973_v60 = vpack.c.bf16 %v965_v50, %v965_v50  ;;  %v974_v0 = vpack.c.bf16 %v968_v58, %v968_v58 }
 0x256   : > { %v1361_v5 = vpack.c.bf16 %v1347_v63, %v1347_v63  ;;  %v1350_v6 = vadd.f32 %v2943_v56, %v1349_v4  ;;  %v1554_v63 = vsel %vm1365_vm3, %v1205_v51, 0  ;;  %v1600_v52 = vsel %vm1365_vm3, %v1206_v61, 0 }
 0x257   : > { %v3707_v7 = vsel %vm1842_vm2, %v1363_v2, 0  ;;  %v1364_v8 = vpack.c.bf16 %v1358_v3, %v1358_v3  ;;  %v1202_v2 = vadd.f32 %v3693_v53, %v2923_v35  ;;  %v1035_v3 = vadd.f32 %v2903_v48, %v3700_v59  ;;  %v814_v35 = vld [vmem:[#allocation2 + $0x18] sm:$0xff] }
 0x258   : > { %v3710_v9 = vsel %vm1842_vm2, %v1361_v5, 0  ;;  %v1362_v10 = vpack.c.bf16 %v1350_v6, %v1350_v6  ;;  %v1038_v4 = vadd.f32 %v2903_v48, %v3704_v1  ;;  %v1646_v53 = vsel %vm1365_vm3, %v1207_v49, 0 }
 0x259   : > { %v3714_v12 = vsel %vm1842_vm2, %v1364_v8, 0  ;;  %v3094_v13 = vpop.f32.mrb[8].mxu0  ;;  %v1208_v5 = vpack.c.bf16 %v1202_v2, %v1202_v2  ;;  %v1049_v6 = vpack.c.bf16 %v1035_v3, %v1035_v3 }
 0x25a   : > { %v3717_v14 = vsel %vm1842_vm2, %v1362_v10, 0  ;;  %v1112_v15 = vpop.f32.mrb[9].mxu0  ;;  %v1121_v22 = vadd.f32 %v3094_v13, %v2913_v11  ;;  %v1050_v8 = vpack.c.bf16 %v1038_v4, %v1038_v4  ;;  %v1046_v13 = vadd.f32 %v3702_v62, %v2903_v48  ;;  %v811_v62 = vld [vmem:[#allocation2] sm:$0xff] }
 0x25b   : > { %v1113_v16 = vadd.f32 %v2913_v11, %v1112_v15  ;;  %v3095_v17 = vpop.f32.mrb[10].mxu0  ;;  %v1692_v10 = vsel %vm1365_vm3, %v1208_v5, 0 }
 0x25c   : > { %v1115_v18 = vpop.f32.mrb[11].mxu0  ;;  %v1124_v27 = vadd.f32 %v3095_v17, %v2913_v11  ;;  %v1129_v33 = vpack.c.bf16 %v1121_v22, %v1121_v22 }
 0x25d   : > { %v1127_v19 = vpack.c.bf16 %v1113_v16, %v1113_v16  ;;  %v1116_v20 = vadd.f32 %v2913_v11, %v1115_v18  ;;  %v1043_v11 = vadd.f32 %v3698_v57, %v2903_v48  ;;  %v1052_v18 = vpack.c.bf16 %v1046_v13, %v1046_v13 }
 0x25e   : > { %v1130_v40 = vpack.c.bf16 %v1124_v27, %v1124_v27  ;;  %v1462_v45 = vsel %vm1365_vm3, %v1129_v33, 0  ;;  %v813_v33 = vld [vmem:[#allocation2 + $0x10] sm:$0xff] }
 0x25f   : > { %v1370_v23 = vsel %vm1365_vm3, %v1127_v19, 0  ;;  %v1128_v24 = vpack.c.bf16 %v1116_v20, %v1116_v20  ;;  %v1051_v16 = vpack.c.bf16 %v1043_v11, %v1043_v11 }
 0x260   : > { %3121 = vmatpush3.bf16.xpose.msra.mxu0 %v1370_v23  ;;  %v1508_v56 = vsel %vm1365_vm3, %v1130_v40, 0 }
 0x261   : > { %v1416_v28 = vsel %vm1365_vm3, %v1128_v24, 0  ;;  %v3110_v29 = vpop.f32.mrb[12].mxu0  ;;  %3132 = vmatprep.subr.bf16.mxu0 %v3441_v47 }
 0x262   : > { %v1277_v30 = vadd.f32 %v3110_v29, %v3722_v25  ;;  %v1268_v31 = vpop.f32.mrb[13].mxu0  ;;  %3127 = vmatpush3.bf16.xpose.msra.mxu1 %v1416_v28 }
 0x263   : > { %v3111_v34 = vpop.f32.mrb[14].mxu0  ;;  %3138 = vmatprep.subr.bf16.mxu1 %v3441_v47  ;;  %v1269_v59 = vadd.f32 %v3722_v25, %v1268_v31 }
 0x264   : > { %v1285_v36 = vpack.c.bf16 %v1277_v30, %v1277_v30  ;;  %v1280_v37 = vadd.f32 %v3111_v34, %v3722_v25  ;;  %v1271_v38 = vpop.f32.mrb[15].mxu0 }
 0x265   : > { %v1272_v1 = vadd.f32 %v3722_v25, %v1271_v38  ;;  %v1283_v15 = vpack.c.bf16 %v1269_v59, %v1269_v59 }
 0x266   : > { %v3731_v41 = vsel %vm1842_vm2, %v1285_v36, 0  ;;  %v1286_v42 = vpack.c.bf16 %v1280_v37, %v1280_v37 }
 0x267   : > { %3123 = vmatmul.mubr.msk.bf16.vlgmr.msra.gmra.mrb[16].mxu0 %vm1365_vm3, %v971_v39  ;;  %v1284_v17 = vpack.c.bf16 %v1272_v1, %v1272_v1  ;;  %v1844_v57 = vsel %vm1842_vm2, %v1283_v15, 0 }
 0x268   : > { %v3736_v46 = vsel %vm1842_vm2, %v1286_v42, 0  ;;  %3133 = vmatpush3.bf16.xpose.msra.mxu0 %v1462_v45  ;;  %3134 = vmatprep.mubr.msk.bf16.mxu0 %vm3442_vm1, %v3441_v47 }
 0x269   : > { %3129 = vmatmul.mubr.msk.bf16.vlgmr.msra.gmra.mrb[8].mxu1 %vm1365_vm3, %v972_v44  ;;  %3144 = vmatprep.subr.bf16.mxu0 %v3441_v47  ;;  %v1890_v19 = vsel %vm1842_vm2, %v1284_v17, 0 }
 0x26a   : > { %3139 = vmatpush3.bf16.xpose.msra.mxu1 %v1508_v56  ;;  %3140 = vmatprep.mubr.msk.bf16.mxu1 %vm3442_vm1, %v3441_v47 }
 0x26b   : > { %3150 = vmatprep.subr.bf16.mxu1 %v3441_v47 }
 0x26f   : > { %3135 = vmatmul.mubr.msk.bf16.vlgmr.msra.gmra.mrb[20].mxu0 %vm1365_vm3, %v973_v60 }
 0x270   : > { %3145 = vmatpush3.bf16.xpose.msra.mxu0 %v1554_v63  ;;  %3146 = vmatprep.mubr.msk.bf16.mxu0 %vm3442_vm1, %v3441_v47 }
 0x271   : > { %3141 = vmatmul.mubr.msk.bf16.vlgmr.msra.gmra.mrb[12].mxu1 %vm1365_vm3, %v974_v0  ;;  %3156 = vmatprep.subr.bf16.mxu0 %v3441_v47 }
 0x272   : > { %3151 = vmatpush3.bf16.xpose.msra.mxu1 %v1600_v52  ;;  %3152 = vmatprep.mubr.msk.bf16.mxu1 %vm3442_vm1, %v3441_v47 }
 0x273   : > { %3162 = vmatprep.subr.bf16.mxu1 %v3441_v47 }
 0x277   : > { %3147 = vmatmul.mubr.msk.bf16.vlgmr.msra.gmra.mrb[24].mxu0 %vm1365_vm3, %v1049_v6 }
 0x278   : > { %3157 = vmatpush3.bf16.xpose.msra.mxu0 %v1646_v53  ;;  %3158 = vmatprep.mubr.msk.bf16.mxu0 %vm3442_vm1, %v3441_v47 }
 0x279   : > { %3153 = vmatmul.mubr.msk.bf16.vlgmr.msra.gmra.mrb[16].mxu1 %vm1365_vm3, %v1050_v8  ;;  %3168 = vmatprep.subr.bf16.mxu0 %v3441_v47 }
 0x27a   : > { %3163 = vmatpush3.bf16.xpose.msra.mxu1 %v1692_v10  ;;  %3164 = vmatprep.mubr.msk.bf16.mxu1 %vm3442_vm1, %v3441_v47 }
 0x27b   : > { %3174 = vmatprep.subr.bf16.mxu1 %v3441_v47 }
 0x27f   : > { %3159 = vmatmul.mubr.msk.bf16.vlgmr.msra.gmra.mrb[28].mxu0 %vm1365_vm3, %v1051_v16 }
 0x280   : > { %3169 = vmatpush3.bf16.msra.mxu0 %v1844_v57  ;;  %3170 = vmatprep.mubr.msk.bf16.mxu0 %vm3442_vm1, %v3441_v47 }
 0x281   : > { %3165 = vmatmul.mubr.msk.bf16.vlgmr.msra.gmra.mrb[20].mxu1 %vm1365_vm3, %v1052_v18  ;;  %3180 = vmatprep.subr.bf16.mxu0 %v3441_v47 }
 0x282   : > { %3175 = vmatpush3.bf16.msra.mxu1 %v1890_v19  ;;  %3176 = vmatprep.mubr.msk.bf16.mxu1 %vm3442_vm1, %v3441_v47 }
 0x283   : > { %3186 = vmatprep.subr.bf16.mxu1 %v3441_v47 }
 0x33a   : > { %v1406_v20 = vpop.f32.mrb[16].mxu0 }
 0x33b   : > { %v1734_v22 = vadd.f32 %v1406_v20, %v811_v62  ;;  %v3124_v23 = vpop.f32.mrb[17].mxu0 }
 0x33c   : > { %v1409_v24 = vpop.f32.mrb[18].mxu0  ;;  %v1452_v25 = vpop.f32.mrb[8].mxu1 }
 0x33d   : > { %v1735_v26 = vadd.f32 %v1452_v25, %v812_v21  ;;  %v3125_v27 = vpop.f32.mrb[19].mxu0  ;;  %v3130_v28 = vpop.f32.mrb[9].mxu1  ;;  %v1743_v29 = vsel %vm1742_vm4, %v1734_v22, -inf }
 0x33e   : > { %v1455_v30 = vpop.f32.mrb[10].mxu1  ;;  %1744 = vmax.xlane.f32.xlu0 %v1743_v29 }
 0x33f   : > { %v3131_v31 = vpop.f32.mrb[11].mxu1  ;;  %v1746_v32 = vsel %vm1742_vm4, %v1735_v26, -inf }
 0x340   : > { %1747 = vmax.xlane.f32.xlu1 %v1746_v32 }
 0x342   : > { %v1498_v34 = vpop.f32.mrb[20].mxu0 }
 0x343   : > { %v1736_v36 = vadd.f32 %v1498_v34, %v813_v33  ;;  %v3136_v37 = vpop.f32.mrb[21].mxu0 }
 0x344   : > { %v1501_v38 = vpop.f32.mrb[22].mxu0  ;;  %v1544_v39 = vpop.f32.mrb[12].mxu1 }
 0x345   : > { %v1737_v40 = vadd.f32 %v1544_v39, %v814_v35  ;;  %v3137_v42 = vpop.f32.mrb[23].mxu0  ;;  %v3142_v43 = vpop.f32.mrb[13].mxu1  ;;  %v1749_v44 = vsel %vm1742_vm4, %v1736_v36, -inf }
 0x346   : > { %v1547_v45 = vpop.f32.mrb[14].mxu1  ;;  %1750 = vmax.xlane.f32.xlu0 %v1749_v44 }
 0x347   : > { %v3143_v50 = vpop.f32.mrb[15].mxu1  ;;  %v1752_v54 = vsel %vm1742_vm4, %v1737_v40, -inf }
 0x348   : > { %1753 = vmax.xlane.f32.xlu1 %v1752_v54 }
 0x34a   : > { %v1590_v56 = vpop.f32.mrb[24].mxu0 }
 0x34b   : > { %v1738_v51 = vadd.f32 %v1590_v56, %v811_v62  ;;  %v3148_v58 = vpop.f32.mrb[25].mxu0 }
 0x34c   : > { %v1593_v60 = vpop.f32.mrb[26].mxu0  ;;  %v1636_v61 = vpop.f32.mrb[16].mxu1 }
 0x34d   : > { %v1739_v48 = vadd.f32 %v1636_v61, %v812_v21  ;;  %v3149_v55 = vpop.f32.mrb[27].mxu0  ;;  %v3154_v63 = vpop.f32.mrb[17].mxu1  ;;  %v1755_v0 = vsel %vm1742_vm4, %v1738_v51, -inf }
 0x34e   : > { %v1639_v2 = vpop.f32.mrb[18].mxu1  ;;  %1756 = vmax.xlane.f32.xlu0 %v1755_v0 }
 0x34f   : > { %v3155_v52 = vpop.f32.mrb[19].mxu1  ;;  %v1758_v3 = vsel %vm1742_vm4, %v1739_v48, -inf }
 0x350   : > { %1759 = vmax.xlane.f32.xlu1 %v1758_v3 }
 0x352   : > { %v1682_v49 = vpop.f32.mrb[28].mxu0 }
 0x353   : > { %v1740_v4 = vadd.f32 %v1682_v49, %v813_v33  ;;  %v3160_v5 = vpop.f32.mrb[29].mxu0 }
 0x354   : > { %v1685_v6 = vpop.f32.mrb[30].mxu0  ;;  %v1728_v53 = vpop.f32.mrb[20].mxu1 }
 0x355   : > { %v1741_v8 = vadd.f32 %v1728_v53, %v814_v35  ;;  %v3161_v59 = vpop.f32.mrb[31].mxu0  ;;  %v3166_v10 = vpop.f32.mrb[21].mxu1  ;;  %v1761_v11 = vsel %vm1742_vm4, %v1740_v4, -inf }
 0x356   : > { %v1731_v1 = vpop.f32.mrb[22].mxu1  ;;  %1762 = vmax.xlane.f32.xlu0 %v1761_v11 }
 0x357   : > { %v3167_v13 = vpop.f32.mrb[23].mxu1  ;;  %v1764_v15 = vsel %vm1742_vm4, %v1741_v8, -inf }
 0x358   : > { %1765 = vmax.xlane.f32.xlu1 %v1764_v15 }
 0x3cb   : > { %v1745_v16 = vpop.xlane.xlu0 %1744 }
 0x3cc   : > { %v1767_v17 = vsub.f32 %v1734_v22, %v1745_v16 }
 0x3cd   : > { %v1748_v18 = vpop.xlane.xlu1 %1747 }
 0x3ce   : > { %v1775_v57 = vmul.f32 1.442695, %v1767_v17  ;;  %v1768_v19 = vsub.f32 %v1735_v26, %v1748_v18 }
 0x3d0   : > { %3332 = vpow2.f32 %v1775_v57  ;;  %v1777_v62 = vmul.f32 1.442695, %v1768_v19 }
 0x3d2   : > { %3334 = vpow2.f32 %v1777_v62 }
 0x3d3   : > { %v1751_v20 = vpop.xlane.xlu0 %1750 }
 0x3d4   : > { %v1769_v21 = vsub.f32 %v1736_v36, %v1751_v20 }
 0x3d5   : > { %v1754_v23 = vpop.xlane.xlu1 %1753 }
 0x3d6   : > { %v1779_v24 = vmul.f32 1.442695, %v1769_v21  ;;  %v1770_v25 = vsub.f32 %v1737_v40, %v1754_v23 }
 0x3d8   : > { %3336 = vpow2.f32 %v1779_v24  ;;  %v1781_v27 = vmul.f32 1.442695, %v1770_v25  ;;  %v3312_v25 = vld [vmem:[%s3993_s15 + $0x8] sm:$0xff]  }
 0x3da   : > { %v3333_v28 = vpop.eup %3332  ;;  %3338 = vpow2.f32 %v1781_v27  ;;  %v3313_v27 = vld [vmem:[%s3993_s15] sm:$0xff]  }
 0x3db   : > { %v1757_v29 = vpop.xlane.xlu0 %1756  ;;  %v1791_v30 = vsel %vm1742_vm4, %v3333_v28, 0.0 }
 0x3dc   : > { %v3335_v31 = vpop.eup %3334  ;;  %v1771_v22 = vsub.f32 %v1738_v51, %v1757_v29  ;;  %1792 = vadd.xlane.f32.xlu0 %v1791_v30 }
 0x3dd   : > { %v1760_v32 = vpop.xlane.xlu1 %1759  ;;  %v1794_v26 = vsel %vm1742_vm4, %v3335_v31, 0.0 }
 0x3de   : > { %v1783_v33 = vmul.f32 1.442695, %v1771_v22  ;;  %v1772_v34 = vsub.f32 %v1739_v48, %v1760_v32  ;;  %1795 = vadd.xlane.f32.xlu1 %v1794_v26 }
 0x3e0   : > { %3340 = vpow2.f32 %v1783_v33  ;;  %v1785_v35 = vmul.f32 1.442695, %v1772_v34 }
 0x3e2   : > { %v3337_v36 = vpop.eup %3336  ;;  %3342 = vpow2.f32 %v1785_v35 }
 0x3e3   : > { %v1763_v37 = vpop.xlane.xlu0 %1762  ;;  %v1797_v38 = vsel %vm1742_vm4, %v3337_v36, 0.0 }
 0x3e4   : > { %v3339_v39 = vpop.eup %3338  ;;  %v1773_v40 = vsub.f32 %v1740_v4, %v1763_v37  ;;  %1798 = vadd.xlane.f32.xlu0 %v1797_v38 }
 0x3e5   : > { %v1766_v42 = vpop.xlane.xlu1 %1765  ;;  %v1800_v43 = vsel %vm1742_vm4, %v3339_v39, 0.0 }
 0x3e6   : > { %v1787_v44 = vmul.f32 1.442695, %v1773_v40  ;;  %v1774_v45 = vsub.f32 %v1741_v8, %v1766_v42  ;;  %1801 = vadd.xlane.f32.xlu1 %v1800_v43 }
 0x3e8   : > { %3344 = vpow2.f32 %v1787_v44  ;;  %v1789_v50 = vmul.f32 1.442695, %v1774_v45 }
 0x3ea   : > { %v3341_v54 = vpop.eup %3340  ;;  %3346 = vpow2.f32 %v1789_v50 }
 0x3eb   : > { %v1803_v56 = vsel %vm1742_vm4, %v3341_v54, 0.0 }
 0x3ec   : > { %v3343_v51 = vpop.eup %3342  ;;  %1804 = vadd.xlane.f32.xlu0 %v1803_v56 }
 0x3ed   : > { %v1806_v58 = vsel %vm1742_vm4, %v3343_v51, 0.0 }
 0x3ee   : > { %1807 = vadd.xlane.f32.xlu1 %v1806_v58 }
 0x3f2   : > { %v3802_v60 = vpop.eup %3344 }
 0x3f3   : > { %v1809_v61 = vsel %vm1742_vm4, %v3802_v60, 0.0 }
 0x3f4   : > { %v3806_v48 = vpop.eup %3346  ;;  %1810 = vadd.xlane.f32.xlu0 %v1809_v61 }
 0x3f5   : > { %v1812_v55 = vsel %vm1742_vm4, %v3806_v48, 0.0 }
 0x3f6   : > { %1813 = vadd.xlane.f32.xlu1 %v1812_v55 }
 0x469   : > { %v1793_v63 = vpop.xlane.xlu0 %1792 }
 0x46a   : > { %3348 = vrcp.f32 %v1793_v63 }
 0x46b   : > { %v1796_v0 = vpop.xlane.xlu1 %1795 }
 0x46c   : > { %3350 = vrcp.f32 %v1796_v0 }
 0x471   : > { %v1799_v2 = vpop.xlane.xlu0 %1798 }
 0x472   : > { %3352 = vrcp.f32 %v1799_v2 }
 0x473   : > { %v1802_v52 = vpop.xlane.xlu1 %1801 }
 0x474   : > { %v3349_v3 = vpop.eup %3348  ;;  %3354 = vrcp.f32 %v1802_v52 }
 0x475   : > { %v1823_v49 = vmul.f32 %v3349_v3, %v3333_v28 }
 0x476   : > { %v3351_v4 = vpop.eup %3350 }
 0x477   : > { %v1824_v5 = vmul.f32 %v3351_v4, %v3335_v31  ;;  %v1831_v6 = vpack.c.bf16 %v1823_v49, %v1823_v49 }
 0x479   : > { %3171 = vmatmul.mubr.msk.bf16.vlgmr.msra.gmra.mrb[32].mxu0 %vm1742_vm4, %v1831_v6  ;;  %v1805_v53 = vpop.xlane.xlu0 %1804  ;;  %v1832_v8 = vpack.c.bf16 %v1824_v5, %v1824_v5  ;;  %v2972_v5 = vld [vmem:[%s3994_s4] ss:$0 sm:$0xff] }
 0x47a   : > { %3181 = vmatpush3.bf16.msra.mxu0 %v3731_v41  ;;  %3356 = vrcp.f32 %v1805_v53  ;;  %3182 = vmatprep.mubr.msk.bf16.mxu0 %vm3442_vm1, %v3441_v47  ;;  %v3380_v53 = vld [vmem:[#allocation3 + $0x10] sm:$0xff] }
 0x47b   : > { %3177 = vmatmul.mubr.msk.bf16.vlgmr.msra.gmra.mrb[24].mxu1 %vm1742_vm4, %v1832_v8  ;;  %v1808_v59 = vpop.xlane.xlu1 %1807  ;;  %3192 = vmatprep.subr.bf16.mxu0 %v3441_v47 }
 0x47c   : > { %v3353_v10 = vpop.eup %3352  ;;  %3187 = vmatpush3.bf16.msra.mxu1 %v3736_v46  ;;  %3358 = vrcp.f32 %v1808_v59  ;;  %3188 = vmatprep.mubr.msk.bf16.mxu1 %vm3442_vm1, %v3441_v47  ;;  %v3381_v59 = vld [vmem:[#allocation3] sm:$0xff] }
 0x47d   : > { %v1825_v11 = vmul.f32 %v3353_v10, %v3337_v36  ;;  %3198 = vmatprep.subr.bf16.mxu1 %v3441_v47 }
 0x47e   : > { %v3355_v41 = vpop.eup %3354 }
 0x47f   : > { %v1826_v1 = vmul.f32 %v3355_v41, %v3339_v39  ;;  %v1833_v13 = vpack.c.bf16 %v1825_v11, %v1825_v11 }
 0x481   : > { %3183 = vmatmul.mubr.msk.bf16.vlgmr.msra.gmra.mrb[36].mxu0 %vm1742_vm4, %v1833_v13  ;;  %v1811_v15 = vpop.xlane.xlu0 %1810  ;;  %v1834_v16 = vpack.c.bf16 %v1826_v1, %v1826_v1  ;;  %v3382_v13 = vld [vmem:[#allocation3 + $0x18] sm:$0xff] }
 0x482   : > { %3193 = vmatpush3.bf16.msra.mxu0 %v3710_v9  ;;  %3360 = vrcp.f32 %v1811_v15  ;;  %3194 = vmatprep.mubr.msk.bf16.mxu0 %vm3442_vm1, %v3441_v47 }
 0x483   : > { %3189 = vmatmul.mubr.msk.bf16.vlgmr.msra.gmra.mrb[28].mxu1 %vm1742_vm4, %v1834_v16  ;;  %v1814_v46 = vpop.xlane.xlu1 %1813  ;;  %3204 = vmatprep.subr.bf16.mxu0 %v3441_v47  ;;  %v3383_v16 = vld [vmem:[#allocation3 + $0x8] sm:$0xff] }
 0x484   : > { %v3357_v17 = vpop.eup %3356  ;;  %3199 = vmatpush3.bf16.msra.mxu1 %v3717_v14  ;;  %3362 = vrcp.f32 %v1814_v46  ;;  %3200 = vmatprep.mubr.msk.bf16.mxu1 %vm3442_vm1, %v3441_v47 }
 0x485   : > { %v1827_v18 = vmul.f32 %v3357_v17, %v3341_v54  ;;  %3210 = vmatprep.subr.bf16.mxu1 %v3441_v47 }
 0x486   : > { %v3359_v9 = vpop.eup %3358 }
 0x487   : > { %v1828_v57 = vmul.f32 %v3359_v9, %v3343_v51  ;;  %v1835_v19 = vpack.c.bf16 %v1827_v18, %v1827_v18 }
 0x489   : > { %3195 = vmatmul.mubr.msk.bf16.vlgmr.msra.gmra.mrb[40].mxu0 %vm1742_vm4, %v1835_v19  ;;  %v1836_v62 = vpack.c.bf16 %v1828_v57, %v1828_v57 }
 0x48a   : > { %3205 = vmatpush3.bf16.msra.mxu0 %v3707_v7  ;;  %3206 = vmatprep.mubr.msk.bf16.mxu0 %vm3442_vm1, %v3441_v47 }
 0x48b   : > { %3201 = vmatmul.mubr.msk.bf16.vlgmr.msra.gmra.mrb[32].mxu1 %vm1742_vm4, %v1836_v62  ;;  %3216 = vmatprep.subr.bf16.mxu0 %v3312_v25 }
 0x48c   : > { %v3361_v14 = vpop.eup %3360  ;;  %3211 = vmatpush3.bf16.msra.mxu1 %v3714_v12  ;;  %3212 = vmatprep.mubr.msk.bf16.mxu1 %vm3442_vm1, %v3441_v47 }
 0x48d   : > { %v1829_v20 = vmul.f32 %v3361_v14, %v3802_v60 }
 0x48e   : > { %v3363_v21 = vpop.eup %3362 }
 0x48f   : > { %v1830_v23 = vmul.f32 %v3363_v21, %v3806_v48  ;;  %v1837_v24 = vpack.c.bf16 %v1829_v20, %v1829_v20 }
 0x491   : > { %3207 = vmatmul.mubr.msk.bf16.vlgmr.msra.gmra.mrb[44].mxu0 %vm1742_vm4, %v1837_v24  ;;  %v1838_v7 = vpack.c.bf16 %v1830_v23, %v1830_v23 }
 0x492   : > { %3217 = vmatpush3.bf16.msra.mxu0 %v3312_v25 }
 0x493   : > { %3213 = vmatmul.mubr.msk.bf16.vlgmr.msra.gmra.mrb[36].mxu1 %vm1742_vm4, %v1838_v7  ;;  %3222 = vmatprep.subr.bf16.mxu0 %v3313_v27 }
 0x54c   : > { %v1880_v12 = vpop.f32.mrb[32].mxu0 }
 0x54d   : > { %v3172_v28 = vpop.f32.mrb[33].mxu0 }
 0x54e   : > { %v1883_v29 = vpop.f32.mrb[34].mxu0  ;;  %v1926_v47 = vpop.f32.mrb[24].mxu1 }
 0x54f   : > { %v2208_v30 = vpack.c.bf16 %v1926_v47, %v1880_v12  ;;  %v3173_v31 = vpop.f32.mrb[35].mxu0  ;;  %v3178_v22 = vpop.f32.mrb[25].mxu1 }
 0x550   : > { %v1929_v32 = vpop.f32.mrb[26].mxu1 }
 0x551   : > { %v3179_v26 = vpop.f32.mrb[27].mxu1 }
 0x554   : > { %v1972_v33 = vpop.f32.mrb[36].mxu0 }
 0x555   : > { %v3184_v34 = vpop.f32.mrb[37].mxu0 }
 0x556   : > { %v1975_v35 = vpop.f32.mrb[38].mxu0  ;;  %v2018_v36 = vpop.f32.mrb[28].mxu1 }
 0x557   : > { %v2209_v37 = vpack.c.bf16 %v2018_v36, %v1972_v33  ;;  %v3185_v38 = vpop.f32.mrb[39].mxu0  ;;  %v3190_v39 = vpop.f32.mrb[29].mxu1 }
 0x558   : > { %v2021_v40 = vpop.f32.mrb[30].mxu1  ;;  %v3315_v38 = vld [vmem:[%s3592_s30 + $0x8] sm:$0xff]  }
 0x559   : > { %v3191_v42 = vpop.f32.mrb[31].mxu1 }
 0x55c   : > { %v2064_v43 = vpop.f32.mrb[40].mxu0 }
 0x55d   : > { %v3196_v44 = vpop.f32.mrb[41].mxu0 }
 0x55e   : > { %v2067_v45 = vpop.f32.mrb[42].mxu0  ;;  %v2110_v50 = vpop.f32.mrb[32].mxu1 }
 0x55f   : > { %v2212_v54 = vpack.c.bf16 %v2110_v50, %v2064_v43  ;;  %v3197_v56 = vpop.f32.mrb[43].mxu0  ;;  %v3202_v51 = vpop.f32.mrb[33].mxu1 }
 0x560   : > { %v2113_v58 = vpop.f32.mrb[34].mxu1 }
 0x561   : > { %v3203_v60 = vpop.f32.mrb[35].mxu1  ;;  %3218 = vmatprep.mubr.msk.bf16.mxu0 %vm1365_vm3, %v2212_v54 }
 0x564   : > { %v2156_v61 = vpop.f32.mrb[44].mxu0 }
 0x565   : > { %v3208_v48 = vpop.f32.mrb[45].mxu0 }
 0x566   : > { %v2159_v55 = vpop.f32.mrb[46].mxu0  ;;  %v2202_v63 = vpop.f32.mrb[36].mxu1  ;;  %v2973_v48 = vld [vmem:[%s692_s21] ss:$0 sm:$0xff] }
 0x567   : > { %v2213_v0 = vpack.c.bf16 %v2202_v63, %v2156_v61  ;;  %v3209_v2 = vpop.f32.mrb[47].mxu0  ;;  %v3214_v52 = vpop.f32.mrb[37].mxu1 }
 0x568   : > { %v2205_v3 = vpop.f32.mrb[38].mxu1 }
 0x569   : > { %v3215_v49 = vpop.f32.mrb[39].mxu1  ;;  %3219 = vmatmul.mubr.msk.bf16.vlgmr.msra.gmra.mrb[48].mxu0 %vm1365_vm3, %v2213_v0  ;;  %v2974_v3 = vld [vmem:[%s695_s25] ss:$0 sm:$0xff] }
 0x56a   : > { %3223 = vmatpush3.bf16.msra.mxu0 %v3313_v27  ;;  %3224 = vmatprep.mubr.msk.bf16.mxu0 %vm1365_vm3, %v2208_v30 }
 0x575   : > { %3225 = vmatmul.mubr.msk.bf16.vlgmr.msra.gmra.mrb[48].mxu0 %vm1365_vm3, %v2209_v37  ;;  %v3314_v37 = vld [vmem:[%s3592_s30] sm:$0xff]  }
 0x576   : > { %3228 = vmatprep.subr.bf16.mxu1 %v3314_v37 }
 0x577   : > { %3229 = vmatpush3.bf16.msra.mxu1 %v3314_v37 }
 0x578   : > { %3230 = vmatprep.subr.bf16.mxu1 %v3315_v38 }
 0x57b   : > { %3231 = vmatpush3.bf16.msra.mxu1 %v3315_v38 }
 0x648   : > { %v3226_v4 = vpop.f32.mrb[48].mxu0 }
 0x649   : > { %v2324_v6 = vpop.f32.mrb[49].mxu0  ;;  %v2341_v8 = vadd.f32 %v3380_v53, %v3226_v4 }
 0x64a   : > { %v2339_v10 = vadd.f32 %v3381_v59, %v2324_v6  ;;  %v3227_v11 = vpop.f32.mrb[50].mxu0 }
 0x64b   : > { %v2327_v41 = vpop.f32.mrb[51].mxu0  ;;  %v2342_v15 = vadd.f32 %v3382_v13, %v3227_v11  ;;  %v3855_v17 = vadd.f32 %v2972_v5, %v2341_v8 }
 0x64c   : > { %v3853_v1 = vadd.f32 %v2972_v5, %v2339_v10  ;;  %v2340_v46 = vadd.f32 %v3383_v16, %v2327_v41  ;;  %v3316_v16 = vld [vmem:[%s3602_s5] sm:$0xff]  }
 0x64d   : > { %v3861_v57 = vadd.f32 %v2972_v5, %v2342_v15  ;;  %v2362_v62 = vsel %vm817_vm0, %v3855_v17, 0.0  ;;  %3236 = vmatprep.subr.bf16.mxu1 %v3316_v16 }
 0x64e   : > { %v3857_v18 = vadd.f32 %v2972_v5, %v2340_v46  ;;  %v2356_v9 = vsel %vm817_vm0, %v3853_v1, 0.0  ;;  %v3317_v46 = vld [vmem:[%s3602_s5 + $0x8] sm:$0xff]  }
 0x64f   : > { %2357 = vadd.xlane.f32.xlu0 %v2356_v9  ;;  %v2365_v14 = vsel %vm817_vm0, %v3861_v57, 0.0  ;;  %v3318_v9 = vld [vmem:[%s3602_s5 + $0x10] sm:$0xff]  }
 0x650   : > { %v2359_v19 = vsel %vm817_vm0, %v3857_v18, 0.0 }
 0x651   : > { %2360 = vadd.xlane.f32.xlu1 %v2359_v19  ;;  %v3319_v19 = vld [vmem:[%s3602_s5 + $0x18] sm:$0xff]  }
 0x653   : > { %2363 = vadd.xlane.f32.xlu0 %v2362_v62  ;;  %v3320_v62 = vld [vmem:[%s3602_s5 + $0x20] sm:$0xff]  }
 0x655   : > { %2366 = vadd.xlane.f32.xlu1 %v2365_v14  ;;  %v3321_v14 = vld [vmem:[%s3602_s5 + $0x28] sm:$0xff]  }
 0x6dc   : > { %v2358_v20 = vpop.xlane.xlu0 %2357 }
 0x6dd   : > { %v2368_v21 = vmul.f32 0.03125, %v2358_v20  ;;  %v3322_v20 = vld [vmem:[%s3602_s5 + $0x30] sm:$0xff]  }
 0x6de   : > { %v2361_v23 = vpop.xlane.xlu1 %2360 }
 0x6df   : > { %v2372_v24 = vsub.f32 %v3853_v1, %v2368_v21  ;;  %v2369_v7 = vmul.f32 0.03125, %v2361_v23  ;;  %v3323_v21 = vld [vmem:[%s3602_s5 + $0x38] sm:$0xff]   ;;  %v2975_v23 = vld [vmem:[%s703_s26] ss:$0 sm:$0xff] }
 0x6e0   : > { %v2364_v25 = vpop.xlane.xlu0 %2363 }
 0x6e1   : > { %v2373_v27 = vsub.f32 %v3857_v18, %v2369_v7  ;;  %v2370_v12 = vmul.f32 0.03125, %v2364_v25  ;;  %v2376_v28 = vmul.f32 %v2372_v24, %v2372_v24 }
 0x6e2   : > { %v2367_v29 = vpop.xlane.xlu1 %2366 }
 0x6e3   : > { %v2374_v47 = vsub.f32 %v3855_v17, %v2370_v12  ;;  %v2371_v30 = vmul.f32 0.03125, %v2367_v29  ;;  %v2380_v31 = vsel %vm817_vm0, %v2376_v28, 0.0  ;;  %v2377_v22 = vmul.f32 %v2373_v27, %v2373_v27 }
 0x6e4   : > { %2381 = vadd.xlane.f32.xlu0 %v2380_v31 }
 0x6e5   : > { %v2375_v32 = vsub.f32 %v3861_v57, %v2371_v30  ;;  %v2383_v26 = vsel %vm817_vm0, %v2377_v22, 0.0  ;;  %v2378_v33 = vmul.f32 %v2374_v47, %v2374_v47 }
 0x6e6   : > { %2384 = vadd.xlane.f32.xlu1 %v2383_v26 }
 0x6e7   : > { %v2386_v34 = vsel %vm817_vm0, %v2378_v33, 0.0  ;;  %v2379_v35 = vmul.f32 %v2375_v32, %v2375_v32 }
 0x6e8   : > { %2387 = vadd.xlane.f32.xlu0 %v2386_v34 }
 0x6e9   : > { %v2389_v36 = vsel %vm817_vm0, %v2379_v35, 0.0 }
 0x6ea   : > { %2390 = vadd.xlane.f32.xlu1 %v2389_v36 }
 0x771   : > { %v2382_v39 = vpop.xlane.xlu0 %2381 }
 0x772   : > { %v2392_v40 = vmul.f32 0.03125, %v2382_v39 }
 0x773   : > { %v2385_v42 = vpop.xlane.xlu1 %2384 }
 0x774   : > { %v2396_v43 = vadd.f32 1e-05, %v2392_v40  ;;  %v2393_v44 = vmul.f32 0.03125, %v2385_v42 }
 0x775   : > { %v2388_v45 = vpop.xlane.xlu0 %2387 }
 0x776   : > { %3364 = vrsqrt.f32 %v2396_v43  ;;  %v2397_v50 = vadd.f32 1e-05, %v2393_v44  ;;  %v2394_v54 = vmul.f32 0.03125, %v2388_v45 }
 0x777   : > { %v2391_v56 = vpop.xlane.xlu1 %2390 }
 0x778   : > { %3366 = vrsqrt.f32 %v2397_v50  ;;  %v2398_v51 = vadd.f32 1e-05, %v2394_v54  ;;  %v2395_v58 = vmul.f32 0.03125, %v2391_v56 }
 0x77a   : > { %3368 = vrsqrt.f32 %v2398_v51  ;;  %v2399_v60 = vadd.f32 1e-05, %v2395_v58 }
 0x77c   : > { %3370 = vrsqrt.f32 %v2399_v60 }
 0x780   : > { %v3365_v61 = vpop.eup %3364 }
 0x781   : > { %v2404_v55 = vmul.f32 %v3365_v61, %v2372_v24 }
 0x782   : > { %v3367_v63 = vpop.eup %3366 }
 0x783   : > { %v2405_v0 = vmul.f32 %v3367_v63, %v2373_v27  ;;  %v2414_v2 = vmul.f32 %v2973_v48, %v2404_v55 }
 0x784   : > { %v3369_v52 = vpop.eup %3368 }
 0x785   : > { %v2406_v49 = vmul.f32 %v3369_v52, %v2374_v47  ;;  %v2415_v4 = vmul.f32 %v2973_v48, %v2405_v0  ;;  %v2424_v8 = vadd.f32 %v2974_v3, %v2414_v2 }
 0x786   : > { %v3371_v5 = vpop.eup %3370 }
 0x787   : > { %v2416_v6 = vmul.f32 %v2973_v48, %v2406_v49  ;;  %v2407_v53 = vmul.f32 %v3371_v5, %v2375_v32  ;;  %v2425_v59 = vadd.f32 %v2974_v3, %v2415_v4 }
 0x789   : > { %v2417_v10 = vmul.f32 %v2973_v48, %v2407_v53  ;;  %v2428_v11 = vpack.c.bf16 %v2425_v59, %v2424_v8  ;;  %v2426_v41 = vadd.f32 %v2974_v3, %v2416_v6 }
 0x78b   : > { %3232 = vmatprep.mubr.msk.bf16.mxu1 %vm817_vm0, %v2428_v11  ;;  %v2427_v13 = vadd.f32 %v2974_v3, %v2417_v10  ;;  %v2980_v10 = vld [vmem:[%s711_s7] ss:$0 sm:$0xff] }
 0x78d   : > { %v2429_v15 = vpack.c.bf16 %v2427_v13, %v2426_v41 }
 0x78f   : > { %3233 = vmatmul.mubr.msk.bf16.vlgmr.msra.gmra.mrb[40].mxu1 %vm817_vm0, %v2429_v15 }
 0x790   : > { %3237 = vmatpush3.bf16.msra.mxu1 %v3316_v16 }
 0x791   : > { %3238 = vmatprep.subr.bf16.mxu1 %v3317_v46 }
 0x794   : > { %3239 = vmatpush3.bf16.msra.mxu1 %v3317_v46 }
 0x795   : > { %3240 = vmatprep.subr.bf16.mxu1 %v3318_v9 }
 0x798   : > { %3241 = vmatpush3.bf16.msra.mxu1 %v3318_v9 }
 0x799   : > { %3242 = vmatprep.subr.bf16.mxu1 %v3319_v19 }
 0x79c   : > { %3243 = vmatpush3.bf16.msra.mxu1 %v3319_v19 }
 0x79d   : > { %3244 = vmatprep.subr.bf16.mxu1 %v3320_v62 }
 0x7a0   : > { %3245 = vmatpush3.bf16.msra.mxu1 %v3320_v62 }
 0x7a1   : > { %3246 = vmatprep.subr.bf16.mxu1 %v3321_v14 }
 0x7a4   : > { %3247 = vmatpush3.bf16.msra.mxu1 %v3321_v14 }
 0x7a5   : > { %3248 = vmatprep.subr.bf16.mxu1 %v3322_v20 }
 0x7a8   : > { %3249 = vmatpush3.bf16.msra.mxu1 %v3322_v20 }
 0x7a9   : > { %3250 = vmatprep.subr.bf16.mxu1 %v3323_v21 }
 0x7ac   : > { %3251 = vmatpush3.bf16.msra.mxu1 %v3323_v21 }
 0x862   : > { %v3234_v24 = vpop.f32.mrb[40].mxu1 }
 0x863   : > { %v2502_v7 = vadd.f32 %v3234_v24, %v2975_v23  ;;  %v2493_v25 = vpop.f32.mrb[41].mxu1 }
 0x864   : > { %v2494_v27 = vadd.f32 %v2975_v23, %v2493_v25  ;;  %v3235_v12 = vpop.f32.mrb[42].mxu1 }
 0x865   : > { %v2514_v28 = vmul.f32 %v2502_v7, %v2502_v7  ;;  %v2505_v29 = vadd.f32 %v3235_v12, %v2975_v23  ;;  %v2496_v47 = vpop.f32.mrb[43].mxu1  ;;  %v2510_v63 = vmul.f32 0.5, %v2502_v7 }
 0x866   : > { %v2512_v30 = vmul.f32 %v2494_v27, %v2494_v27  ;;  %v2497_v31 = vadd.f32 %v2975_v23, %v2496_v47  ;;  %v2508_v52 = vmul.f32 0.5, %v2494_v27 }
 0x867   : > { %v2518_v22 = vmul.f32 %v2514_v28, %v2502_v7  ;;  %v2515_v32 = vmul.f32 %v2505_v29, %v2505_v29  ;;  %v2511_v0 = vmul.f32 0.5, %v2505_v29 }
 0x868   : > { %v2516_v26 = vmul.f32 %v2512_v30, %v2494_v27  ;;  %v2513_v33 = vmul.f32 %v2497_v31, %v2497_v31  ;;  %v2509_v3 = vmul.f32 0.5, %v2497_v31 }
 0x869   : > { %v2522_v34 = vmul.f32 0.044715, %v2518_v22  ;;  %v2519_v35 = vmul.f32 %v2515_v32, %v2505_v29 }
 0x86a   : > { %v2520_v36 = vmul.f32 0.044715, %v2516_v26  ;;  %v2517_v37 = vmul.f32 %v2513_v33, %v2497_v31 }
 0x86b   : > { %v2526_v38 = vadd.f32 %v2522_v34, %v2502_v7  ;;  %v2523_v39 = vmul.f32 0.044715, %v2519_v35 }
 0x86c   : > { %v2524_v40 = vadd.f32 %v2520_v36, %v2494_v27  ;;  %v2521_v42 = vmul.f32 0.044715, %v2517_v37 }
 0x86d   : > { %v2530_v43 = vmul.f32 0.7978845, %v2526_v38  ;;  %v2527_v44 = vadd.f32 %v2523_v39, %v2505_v29 }
 0x86e   : > { %v2528_v45 = vmul.f32 0.7978845, %v2524_v40  ;;  %v2525_v50 = vadd.f32 %v2521_v42, %v2497_v31 }
 0x86f   : > { %3372 = vtanh.f32 %v2530_v43  ;;  %v2531_v54 = vmul.f32 0.7978845, %v2527_v44 }
 0x870   : > { %3374 = vtanh.f32 %v2528_v45  ;;  %v2529_v56 = vmul.f32 0.7978845, %v2525_v50 }
 0x871   : > { %3376 = vtanh.f32 %v2531_v54 }
 0x872   : > { %3378 = vtanh.f32 %v2529_v56 }
 0x879   : > { %v3373_v51 = vpop.eup %3372 }
 0x87a   : > { %v3375_v58 = vpop.eup %3374  ;;  %v2538_v60 = vadd.f32 1.0, %v3373_v51 }
 0x87b   : > { %v3377_v61 = vpop.eup %3376  ;;  %v2536_v48 = vadd.f32 1.0, %v3375_v58 }
 0x87c   : > { %v3379_v55 = vpop.eup %3378  ;;  %v2539_v2 = vadd.f32 1.0, %v3377_v61  ;;  %v2542_v4 = vmul.f32 %v2538_v60, %v2510_v63 }
 0x87d   : > { %v2537_v49 = vadd.f32 1.0, %v3379_v55  ;;  %v2540_v6 = vmul.f32 %v2536_v48, %v2508_v52 }
 0x87e   : > { %v2543_v5 = vmul.f32 %v2539_v2, %v2511_v0 }
 0x87f   : > { %v2541_v53 = vmul.f32 %v2537_v49, %v2509_v3 }
 0x880   : > { %v2545_v8 = vpack.c.bf16 %v2543_v5, %v2542_v4 }
 0x881   : > { %v2544_v59 = vpack.c.bf16 %v2541_v53, %v2540_v6 }
 0x883   : > { %3252 = vmatprep.mubr.bf16.mxu1 %v2544_v59 }
 0x884   : > { %3253 = vmatmul.mubr.bf16.vlgmr.msra.gmra.mrb[44].mxu1 %v2545_v8 }
 0x957   : > { %v3254_v11 = vpop.f32.mrb[44].mxu1 }
 0x958   : > { %v2660_v41 = vadd.f32 %v3254_v11, %v2980_v10  ;;  %v2651_v13 = vpop.f32.mrb[45].mxu1 }
 0x959   : > { %v2652_v15 = vadd.f32 %v2980_v10, %v2651_v13  ;;  %v3255_v16 = vpop.f32.mrb[46].mxu1 }
 0x95a   : > { %v2668_v46 = vadd.f32 %v2660_v41, %v3855_v17  ;;  %v2663_v9 = vadd.f32 %v3255_v16, %v2980_v10  ;;  %v2654_v19 = vpop.f32.mrb[47].mxu1 }
 0x95b   : > { %v2666_v62 = vadd.f32 %v2652_v15, %v3853_v1  ;;  %v2655_v14 = vadd.f32 %v2980_v10, %v2654_v19 }
 0x95c   : > { %2672 = vst.msk [vmem:[#allocation3 + $0x10] sm:$0xff] %vm817_vm0, %v2668_v46  ;;  %v2669_v20 = vadd.f32 %v2663_v9, %v3861_v57 }
 0x95d   : > { %2670 = vst.msk [vmem:[#allocation3] sm:$0xff] %vm817_vm0, %v2666_v62  ;;  %v2667_v17 = vadd.f32 %v2655_v14, %v3857_v18 }
 0x95e   : > { %2673 = vst.msk [vmem:[#allocation3 + $0x18] sm:$0xff] %vm817_vm0, %v2669_v20 }
 0x95f   : > { %2671 = vst.msk [vmem:[#allocation3 + $0x8] sm:$0xff] %vm817_vm0, %v2667_v17 }
 0x960   : > { %3397 = shalt.err (!%p3394_p13)
}
 0x961   : > { %s3998_s18 = sld [smem:[#allocation15_spill]] }
 0x967   : > { %s3999_s15 = smov %s3998_s18  ;;  %s3398_s28 = scalar_lea.hbm %s3998_s18, 512 }
 0x968   : > { %p3399_p0 = scmp.ne.s32.totalorder %s3999_s15, %s3398_s28  ;;  %p3404_p3 = scmp.lt.u32.totalorder %s3398_s28, %s3999_s15 }
 0x96a   : > { %p3400_p1 = pnand %p3399_p0, %p3915_p6 }
 0x96c   : > { %p3401_p2 = pneg %p3400_p1 }
 0x96e   : > { %p3406_p4 = pnand %p3404_p3, %p3401_p2 }
 0x970   : > { %3409 = shalt.err (!%p3406_p4)
}
 0x971   : > { %s3444_s24 = smov 128   ;;  %s3445_s16 = smov 8  }
 0x972   : > { %3263 = dma.vmem_to_hbm [thread:$0]  (%p3915_p6), %s2684_s0, 512, %s3999_s15, [#allocation4], %s3444_s24, %s3444_s24, %s3445_s16  }
 0x973   : > { %3423 = dma.done.wait (%p3915_p6), [#allocation4], 512  }
 0x974   : > { %3425 = vsyncadd (%p3915_p6), [#allocation4], 4294966784 }
 0x975 PF: > { %s4000_s5 = sld [smem:[#allocation7_spill]]  ;;  %s4001_s18 = sld [smem:[#allocation6_spill]] }
 0x976   : > { %s4002_s19 = sld [smem:[#allocation8_spill]] }
 0x97b   : > { %s26_s20 = sadd.s32 1, %s4000_s5  }
 0x97c   : > { %p23_p5 = scmp.ge.s32.totalorder %s26_s20, 4  }
 0x97e   :  { %25 = sbr.rel (!%p23_p5) target bundleno = 9 (0x9), region = 162 }
 0x985   :  { %2699 = vsyncpa [#allocation4], 1 }
 0x986   :  { %2701 = vsyncpa [#allocation4 + $0x1], 1 }

</bundles_post_ra>
